<compile_context>
chip_gen: v5e
topology: v5e:2x2
jax: 0.10.0
libtpu: 0.0.40
codegen_flags: <defaults>
</compile_context>

<pallas_src>
import functools
import math

import jax
import jax.numpy as jnp
from jax import lax
from jax.experimental import pallas as pl
from jax.experimental.pallas import tpu as pltpu


def _round_up(a, b):
    return ((a + b - 1) // b) * b


def _arc_loss_kernel(li_ref, x_ref, w_ref, out_ref, w_scr, *,
                     s, cos_m, sin_m, th, mm, easy_margin,
                     num_part, tb, batch):
    # li_ref : (padded_B,) int32 scalar-prefetch labels (SMEM)
    # x_ref  : (TB, P, C)   feature block for this batch tile
    # w_ref  : (O, C)       full class-weight matrix (VMEM resident)
    # out_ref: (1, 8, 128)  lane-dense per-tile partial loss sum
    # w_scr  : (TB, P, C)   f32 VMEM scratch for the gathered weight rows
    t = pl.program_id(0)
    P = num_part

    # ---- in-kernel gather of the P contiguous weight rows per sample -------
    def gather_one(b):
        lbl = li_ref[t * tb + b]
        start = pl.multiple_of(lbl * P, P)          # rows lbl*P .. lbl*P+P-1
        w_scr[b] = w_ref[pl.ds(start, P), :].astype(jnp.float32)

    if tb <= 32:
        # Fully unrolled: gives the LLO scheduler visibility across samples.
        for b in range(tb):
            gather_one(b)
    else:
        def gather_body(b, carry):
            gather_one(b)
            return carry
        lax.fori_loop(0, tb, gather_body, 0)

    # ---- normalization (F.normalize, eps=1e-12) -----------------------------
    eps = 1e-12
    x = x_ref[...].astype(jnp.float32)                         # (TB, P, C)
    w = w_scr[...]                                             # (TB, P, C)
    x_n = x / jnp.maximum(jnp.sqrt(jnp.sum(x * x, axis=-1, keepdims=True)), eps)
    w_n = w / jnp.maximum(jnp.sqrt(jnp.sum(w * w, axis=-1, keepdims=True)), eps)

    # ---- diagonal cosine + arc margin (margin only touches l == q) ---------
    cos_diag = jnp.sum(x_n * w_n, axis=-1)                     # (TB, P)
    sine = jnp.sqrt(jnp.clip(1.0 - cos_diag * cos_diag, 0.0, 1.0))
    phi = cos_diag * cos_m - sine * sin_m
    if easy_margin:
        phi = jnp.where(cos_diag > 0.0, phi, cos_diag)
    else:
        phi = jnp.where(cos_diag > th, phi, cos_diag - mm)
    logit_diag = s * phi                                       # (TB, P)

    # ---- logits over the P weight rows of the sample's class (VPU path) ----
    q_idx = lax.broadcasted_iota(jnp.int32, (tb, P), 1)        # query-part index
    logits = []
    for l in range(P):
        cos_l = jnp.sum(x_n * w_n[:, l:l + 1, :], axis=-1)     # (TB, P)
        logits.append(jnp.where(q_idx == l, logit_diag, s * cos_l))

    # ---- stable logsumexp loss:  lse(logits) - logit_diag -------------------
    mx = logits[0]
    for lg in logits[1:]:
        mx = jnp.maximum(mx, lg)
    ssum = jnp.zeros_like(mx)
    for lg in logits:
        ssum = ssum + jnp.exp(lg - mx)
    loss = mx + jnp.log(ssum) - logit_diag                     # (TB, P)

    # ---- mask padded samples, reduce to a per-tile scalar partial sum -------
    g = t * tb + lax.broadcasted_iota(jnp.int32, (tb, P), 0)
    loss = jnp.where(g < batch, loss, 0.0)
    partial = jnp.sum(loss)

    out_ref[...] = jnp.broadcast_to(partial, (1, 8, 128)).astype(jnp.float32)


def arc_margin_part_image_loss(x, weight, label_index, *, num_part,
                               s=20.0, m=0.5, easy_margin=False, tile_b=128):
    """x: (B, num_part, C); weight: (out_features, C); label_index: (B,) int."""
    Bs, P, C = x.shape
    assert P == num_part
    O, C2 = weight.shape
    assert C2 == C

    # Batch-tile size: many samples per grid step; cap to keep VMEM modest
    # (double-buffered x block + f32 scratch + the full weight matrix).  For
    # larger C / tile_b raise vmem_limit_bytes via pltpu.CompilerParams.
    TB = min(int(tile_b), _round_up(Bs, 8))
    padded = _round_up(Bs, TB)
    num_tiles = padded // TB

    if padded != Bs:
        x = jnp.pad(x, ((0, padded - Bs), (0, 0), (0, 0)))
        label_index = jnp.pad(label_index, (0, padded - Bs))
    label_index = label_index.astype(jnp.int32)

    cos_m = math.cos(m)
    sin_m = math.sin(m)
    th = math.cos(math.pi - m)
    mm = math.sin(math.pi - m) * m

    kernel = functools.partial(
        _arc_loss_kernel, s=float(s), cos_m=cos_m, sin_m=sin_m, th=th, mm=mm,
        easy_margin=easy_margin, num_part=P, tb=TB, batch=Bs)

    partials = pl.pallas_call(
        kernel,
        out_shape=jax.ShapeDtypeStruct((num_tiles, 8, 128), jnp.float32),
        grid_spec=pltpu.PrefetchScalarGridSpec(
            num_scalar_prefetch=1,
            grid=(num_tiles,),
            in_specs=[
                pl.BlockSpec((TB, P, C), lambda t, li: (t, 0, 0)),
                pl.BlockSpec((O, C), lambda t, li: (0, 0)),
            ],
            out_specs=pl.BlockSpec((1, 8, 128), lambda t, li: (t, 0, 0)),
            scratch_shapes=[pltpu.VMEM((TB, P, C), jnp.float32)],
        ),
        compiler_params=pltpu.CompilerParams(
            dimension_semantics=("parallel",)),
    )(label_index, x, weight)

    return jnp.sum(partials[:, 0, 0]) / (Bs * P)


def _reference_loss(x, weight, label_index, *, num_part, s=20.0, m=0.5,
                    easy_margin=False):
    """Pure-JAX transliteration of the PyTorch forward, for verification."""
    Bs, P, C = x.shape
    li = (label_index[:, None].astype(jnp.int32) * num_part
          + jnp.arange(num_part, dtype=jnp.int32)[None, :]).reshape(-1)
    w = weight[li].reshape(Bs, num_part, C)
    eps = 1e-12
    x_n = x / jnp.maximum(jnp.linalg.norm(x, axis=-1, keepdims=True), eps)
    w_n = w / jnp.maximum(jnp.linalg.norm(w, axis=-1, keepdims=True), eps)
    cosine = jnp.einsum('bqc,blc->bql', x_n, w_n)
    sine = jnp.sqrt(jnp.clip(1.0 - cosine ** 2, 0.0, 1.0))
    cos_m, sin_m = math.cos(m), math.sin(m)
    th, mm = math.cos(math.pi - m), math.sin(math.pi - m) * m
    phi = cosine * cos_m - sine * sin_m
    if easy_margin:
        phi = jnp.where(cosine > 0, phi, cosine)
    else:
        phi = jnp.where(cosine > th, phi, cosine - mm)
    label = jnp.broadcast_to(jnp.eye(num_part), (Bs, num_part, num_part))
    out = jnp.exp((label * phi + (1.0 - label) * cosine) * s)
    loss = -jnp.log(jnp.sum(label * out, -1) / jnp.sum(out, -1))
    return jnp.mean(loss)


if __name__ == "__main__":
    # Small shapes consistent with the module:
    #   in_features=32, num_part=8, num_classes=4 -> out_features=32, batch=2
    Bs, num_part, in_features = 2, 8, 32
    num_classes = 4
    out_features = num_classes * num_part

    key = jax.random.PRNGKey(0)
    k_x, k_w, k_l = jax.random.split(key, 3)

    # xavier_uniform init for weight (out_features, in_features)
    bound = math.sqrt(6.0 / (in_features + out_features))
    weight = jax.random.uniform(
        k_w, (out_features, in_features), jnp.float32, -bound, bound)

    x = jax.random.normal(k_x, (Bs, num_part, in_features), jnp.float32)
    label_index = jax.random.randint(k_l, (Bs,), 0, num_classes, jnp.int32)

    loss = arc_margin_part_image_loss(
        x, weight, label_index, num_part=num_part, s=20.0, m=0.5,
        easy_margin=False)
    loss = jax.block_until_ready(loss)

    ref = _reference_loss(
        x, weight, label_index, num_part=num_part, s=20.0, m=0.5,
        easy_margin=False)
    assert jnp.allclose(loss, ref, rtol=1e-3, atol=1e-3), (loss, ref)

    print("KERNEL_OK")
</pallas_src>

<mosaic_0001>
module attributes {stable_mosaic.version = 11 : i64} {
  func.func @_arc_loss_kernel(%arg0: i32, %arg1: memref<8xi32, #tpu.memory_space<smem>>, %arg2: memref<8x8x32xf32, #tpu.memory_space<vmem>>, %arg3: memref<32x32xf32, #tpu.memory_space<vmem>>, %arg4: memref<1x8x128xf32, #tpu.memory_space<vmem>>, %arg5: memref<8x8x32xf32, #tpu.memory_space<vmem>>) attributes {dimension_semantics = [#tpu.dimension_semantics<parallel>], iteration_bounds = array<i64: 1>, scalar_prefetch = 1 : i64, scratch_operands = 1 : i64, tpu.core_type = #tpu.core_type<tc>, window_params = [{transform_indices = @transform_0, window_bounds = array<i64: 8, 8, 32>}, {pipeline_mode = #tpu.pipeline_mode<synchronous>, transform_indices = @transform_1, window_bounds = array<i64: 32, 32>}, {transform_indices = @transform_2, window_bounds = array<i64: 1, 8, 128>}]} {
    %c8_i32 = arith.constant 8 : i32
    %0 = arith.muli %arg0, %c8_i32 : i32
    %c0_i32 = arith.constant 0 : i32
    %1 = arith.addi %0, %c0_i32 : i32
    %2 = arith.index_cast %1 : i32 to index
    %3 = memref.load %arg1[%2] : memref<8xi32, #tpu.memory_space<smem>>
    %c8_i32_0 = arith.constant 8 : i32
    %4 = arith.muli %3, %c8_i32_0 : i32
    %5 = tpu.assume_multiple %4, 8 : i32
    %6 = arith.index_cast %5 : i32 to index
    %c0 = arith.constant 0 : index
    %7 = vector.load %arg3[%6, %c0] : memref<32x32xf32, #tpu.memory_space<vmem>>, vector<8x32xf32>
    %c0_1 = arith.constant 0 : index
    %c0_2 = arith.constant 0 : index
    %c0_3 = arith.constant 0 : index
    %8 = vector.load %arg5[%c0_1, %c0_2, %c0_3] : memref<8x8x32xf32, #tpu.memory_space<vmem>>, vector<1x8x32xf32>
    %9 = vector.shape_cast %8 : vector<1x8x32xf32> to vector<8x32xf32>
    %10 = vector.shape_cast %7 : vector<8x32xf32> to vector<1x8x32xf32>
    tpu.vector_store %arg5[%c0_1, %c0_2, %c0_3], %10 {strides = array<i32>} : memref<8x8x32xf32, #tpu.memory_space<vmem>>, vector<1x8x32xf32>,
    %c8_i32_4 = arith.constant 8 : i32
    %11 = arith.muli %arg0, %c8_i32_4 : i32
    %c1_i32 = arith.constant 1 : i32
    %12 = arith.addi %11, %c1_i32 : i32
    %13 = arith.index_cast %12 : i32 to index
    %14 = memref.load %arg1[%13] : memref<8xi32, #tpu.memory_space<smem>>
    %c8_i32_5 = arith.constant 8 : i32
    %15 = arith.muli %14, %c8_i32_5 : i32
    %16 = tpu.assume_multiple %15, 8 : i32
    %17 = arith.index_cast %16 : i32 to index
    %c0_6 = arith.constant 0 : index
    %18 = vector.load %arg3[%17, %c0_6] : memref<32x32xf32, #tpu.memory_space<vmem>>, vector<8x32xf32>
    %c1 = arith.constant 1 : index
    %c0_7 = arith.constant 0 : index
    %c0_8 = arith.constant 0 : index
    %19 = vector.load %arg5[%c1, %c0_7, %c0_8] : memref<8x8x32xf32, #tpu.memory_space<vmem>>, vector<1x8x32xf32>
    %20 = vector.shape_cast %19 : vector<1x8x32xf32> to vector<8x32xf32>
    %21 = vector.shape_cast %18 : vector<8x32xf32> to vector<1x8x32xf32>
    tpu.vector_store %arg5[%c1, %c0_7, %c0_8], %21 {strides = array<i32>} : memref<8x8x32xf32, #tpu.memory_space<vmem>>, vector<1x8x32xf32>,
    %c8_i32_9 = arith.constant 8 : i32
    %22 = arith.muli %arg0, %c8_i32_9 : i32
    %c2_i32 = arith.constant 2 : i32
    %23 = arith.addi %22, %c2_i32 : i32
    %24 = arith.index_cast %23 : i32 to index
    %25 = memref.load %arg1[%24] : memref<8xi32, #tpu.memory_space<smem>>
    %c8_i32_10 = arith.constant 8 : i32
    %26 = arith.muli %25, %c8_i32_10 : i32
    %27 = tpu.assume_multiple %26, 8 : i32
    %28 = arith.index_cast %27 : i32 to index
    %c0_11 = arith.constant 0 : index
    %29 = vector.load %arg3[%28, %c0_11] : memref<32x32xf32, #tpu.memory_space<vmem>>, vector<8x32xf32>
    %c2 = arith.constant 2 : index
    %c0_12 = arith.constant 0 : index
    %c0_13 = arith.constant 0 : index
    %30 = vector.load %arg5[%c2, %c0_12, %c0_13] : memref<8x8x32xf32, #tpu.memory_space<vmem>>, vector<1x8x32xf32>
    %31 = vector.shape_cast %30 : vector<1x8x32xf32> to vector<8x32xf32>
    %32 = vector.shape_cast %29 : vector<8x32xf32> to vector<1x8x32xf32>
    tpu.vector_store %arg5[%c2, %c0_12, %c0_13], %32 {strides = array<i32>} : memref<8x8x32xf32, #tpu.memory_space<vmem>>, vector<1x8x32xf32>,
    %c8_i32_14 = arith.constant 8 : i32
    %33 = arith.muli %arg0, %c8_i32_14 : i32
    %c3_i32 = arith.constant 3 : i32
    %34 = arith.addi %33, %c3_i32 : i32
    %35 = arith.index_cast %34 : i32 to index
    %36 = memref.load %arg1[%35] : memref<8xi32, #tpu.memory_space<smem>>
    %c8_i32_15 = arith.constant 8 : i32
    %37 = arith.muli %36, %c8_i32_15 : i32
    %38 = tpu.assume_multiple %37, 8 : i32
    %39 = arith.index_cast %38 : i32 to index
    %c0_16 = arith.constant 0 : index
    %40 = vector.load %arg3[%39, %c0_16] : memref<32x32xf32, #tpu.memory_space<vmem>>, vector<8x32xf32>
    %c3 = arith.constant 3 : index
    %c0_17 = arith.constant 0 : index
    %c0_18 = arith.constant 0 : index
    %41 = vector.load %arg5[%c3, %c0_17, %c0_18] : memref<8x8x32xf32, #tpu.memory_space<vmem>>, vector<1x8x32xf32>
    %42 = vector.shape_cast %41 : vector<1x8x32xf32> to vector<8x32xf32>
    %43 = vector.shape_cast %40 : vector<8x32xf32> to vector<1x8x32xf32>
    tpu.vector_store %arg5[%c3, %c0_17, %c0_18], %43 {strides = array<i32>} : memref<8x8x32xf32, #tpu.memory_space<vmem>>, vector<1x8x32xf32>,
    %c8_i32_19 = arith.constant 8 : i32
    %44 = arith.muli %arg0, %c8_i32_19 : i32
    %c4_i32 = arith.constant 4 : i32
    %45 = arith.addi %44, %c4_i32 : i32
    %46 = arith.index_cast %45 : i32 to index
    %47 = memref.load %arg1[%46] : memref<8xi32, #tpu.memory_space<smem>>
    %c8_i32_20 = arith.constant 8 : i32
    %48 = arith.muli %47, %c8_i32_20 : i32
    %49 = tpu.assume_multiple %48, 8 : i32
    %50 = arith.index_cast %49 : i32 to index
    %c0_21 = arith.constant 0 : index
    %51 = vector.load %arg3[%50, %c0_21] : memref<32x32xf32, #tpu.memory_space<vmem>>, vector<8x32xf32>
    %c4 = arith.constant 4 : index
    %c0_22 = arith.constant 0 : index
    %c0_23 = arith.constant 0 : index
    %52 = vector.load %arg5[%c4, %c0_22, %c0_23] : memref<8x8x32xf32, #tpu.memory_space<vmem>>, vector<1x8x32xf32>
    %53 = vector.shape_cast %52 : vector<1x8x32xf32> to vector<8x32xf32>
    %54 = vector.shape_cast %51 : vector<8x32xf32> to vector<1x8x32xf32>
    tpu.vector_store %arg5[%c4, %c0_22, %c0_23], %54 {strides = array<i32>} : memref<8x8x32xf32, #tpu.memory_space<vmem>>, vector<1x8x32xf32>,
    %c8_i32_24 = arith.constant 8 : i32
    %55 = arith.muli %arg0, %c8_i32_24 : i32
    %c5_i32 = arith.constant 5 : i32
    %56 = arith.addi %55, %c5_i32 : i32
    %57 = arith.index_cast %56 : i32 to index
    %58 = memref.load %arg1[%57] : memref<8xi32, #tpu.memory_space<smem>>
    %c8_i32_25 = arith.constant 8 : i32
    %59 = arith.muli %58, %c8_i32_25 : i32
    %60 = tpu.assume_multiple %59, 8 : i32
    %61 = arith.index_cast %60 : i32 to index
    %c0_26 = arith.constant 0 : index
    %62 = vector.load %arg3[%61, %c0_26] : memref<32x32xf32, #tpu.memory_space<vmem>>, vector<8x32xf32>
    %c5 = arith.constant 5 : index
    %c0_27 = arith.constant 0 : index
    %c0_28 = arith.constant 0 : index
    %63 = vector.load %arg5[%c5, %c0_27, %c0_28] : memref<8x8x32xf32, #tpu.memory_space<vmem>>, vector<1x8x32xf32>
    %64 = vector.shape_cast %63 : vector<1x8x32xf32> to vector<8x32xf32>
    %65 = vector.shape_cast %62 : vector<8x32xf32> to vector<1x8x32xf32>
    tpu.vector_store %arg5[%c5, %c0_27, %c0_28], %65 {strides = array<i32>} : memref<8x8x32xf32, #tpu.memory_space<vmem>>, vector<1x8x32xf32>,
    %c8_i32_29 = arith.constant 8 : i32
    %66 = arith.muli %arg0, %c8_i32_29 : i32
    %c6_i32 = arith.constant 6 : i32
    %67 = arith.addi %66, %c6_i32 : i32
    %68 = arith.index_cast %67 : i32 to index
    %69 = memref.load %arg1[%68] : memref<8xi32, #tpu.memory_space<smem>>
    %c8_i32_30 = arith.constant 8 : i32
    %70 = arith.muli %69, %c8_i32_30 : i32
    %71 = tpu.assume_multiple %70, 8 : i32
    %72 = arith.index_cast %71 : i32 to index
    %c0_31 = arith.constant 0 : index
    %73 = vector.load %arg3[%72, %c0_31] : memref<32x32xf32, #tpu.memory_space<vmem>>, vector<8x32xf32>
    %c6 = arith.constant 6 : index
    %c0_32 = arith.constant 0 : index
    %c0_33 = arith.constant 0 : index
    %74 = vector.load %arg5[%c6, %c0_32, %c0_33] : memref<8x8x32xf32, #tpu.memory_space<vmem>>, vector<1x8x32xf32>
    %75 = vector.shape_cast %74 : vector<1x8x32xf32> to vector<8x32xf32>
    %76 = vector.shape_cast %73 : vector<8x32xf32> to vector<1x8x32xf32>
    tpu.vector_store %arg5[%c6, %c0_32, %c0_33], %76 {strides = array<i32>} : memref<8x8x32xf32, #tpu.memory_space<vmem>>, vector<1x8x32xf32>,
    %c8_i32_34 = arith.constant 8 : i32
    %77 = arith.muli %arg0, %c8_i32_34 : i32
    %c7_i32 = arith.constant 7 : i32
    %78 = arith.addi %77, %c7_i32 : i32
    %79 = arith.index_cast %78 : i32 to index
    %80 = memref.load %arg1[%79] : memref<8xi32, #tpu.memory_space<smem>>
    %c8_i32_35 = arith.constant 8 : i32
    %81 = arith.muli %80, %c8_i32_35 : i32
    %82 = tpu.assume_multiple %81, 8 : i32
    %83 = arith.index_cast %82 : i32 to index
    %c0_36 = arith.constant 0 : index
    %84 = vector.load %arg3[%83, %c0_36] : memref<32x32xf32, #tpu.memory_space<vmem>>, vector<8x32xf32>
    %c7 = arith.constant 7 : index
    %c0_37 = arith.constant 0 : index
    %c0_38 = arith.constant 0 : index
    %85 = vector.load %arg5[%c7, %c0_37, %c0_38] : memref<8x8x32xf32, #tpu.memory_space<vmem>>, vector<1x8x32xf32>
    %86 = vector.shape_cast %85 : vector<1x8x32xf32> to vector<8x32xf32>
    %87 = vector.shape_cast %84 : vector<8x32xf32> to vector<1x8x32xf32>
    tpu.vector_store %arg5[%c7, %c0_37, %c0_38], %87 {strides = array<i32>} : memref<8x8x32xf32, #tpu.memory_space<vmem>>, vector<1x8x32xf32>,
    %c0_39 = arith.constant 0 : index
    %c0_40 = arith.constant 0 : index
    %c0_41 = arith.constant 0 : index
    %88 = vector.load %arg2[%c0_39, %c0_40, %c0_41] : memref<8x8x32xf32, #tpu.memory_space<vmem>>, vector<8x8x32xf32>
    %c0_42 = arith.constant 0 : index
    %c0_43 = arith.constant 0 : index
    %c0_44 = arith.constant 0 : index
    %89 = vector.load %arg5[%c0_42, %c0_43, %c0_44] : memref<8x8x32xf32, #tpu.memory_space<vmem>>, vector<8x8x32xf32>
    %90 = arith.mulf %88, %88 : vector<8x8x32xf32>
    %cst = arith.constant dense<0.000000e+00> : vector<8x8xf32>
    %91 = vector.multi_reduction <add>, %90, %cst [2] : vector<8x8x32xf32> to vector<8x8xf32>
    %92 = vector.shape_cast %91 : vector<8x8xf32> to vector<8x8x1xf32>
    %93 = math.sqrt %92 : vector<8x8x1xf32>
    %cst_45 = arith.constant 9.99999996E-13 : f32
    %94 = vector.broadcast %cst_45 : f32 to vector<8x8x1xf32>
    %95 = arith.maximumf %93, %94 : vector<8x8x1xf32>
    %96 = vector.broadcast %95 : vector<8x8x1xf32> to vector<8x8x32xf32>
    %97 = arith.divf %88, %96 : vector<8x8x32xf32>
    %98 = arith.mulf %89, %89 : vector<8x8x32xf32>
    %cst_46 = arith.constant dense<0.000000e+00> : vector<8x8xf32>
    %99 = vector.multi_reduction <add>, %98, %cst_46 [2] : vector<8x8x32xf32> to vector<8x8xf32>
    %100 = vector.shape_cast %99 : vector<8x8xf32> to vector<8x8x1xf32>
    %101 = math.sqrt %100 : vector<8x8x1xf32>
    %cst_47 = arith.constant 9.99999996E-13 : f32
    %102 = vector.broadcast %cst_47 : f32 to vector<8x8x1xf32>
    %103 = arith.maximumf %101, %102 : vector<8x8x1xf32>
    %104 = vector.broadcast %103 : vector<8x8x1xf32> to vector<8x8x32xf32>
    %105 = arith.divf %89, %104 : vector<8x8x32xf32>
    %106 = arith.mulf %97, %105 : vector<8x8x32xf32>
    %cst_48 = arith.constant dense<0.000000e+00> : vector<8x8xf32>
    %107 = vector.multi_reduction <add>, %106, %cst_48 [2] : vector<8x8x32xf32> to vector<8x8xf32>
    %108 = arith.mulf %107, %107 : vector<8x8xf32>
    %cst_49 = arith.constant 1.000000e+00 : f32
    %109 = vector.broadcast %cst_49 : f32 to vector<8x8xf32>
    %110 = arith.subf %109, %108 : vector<8x8xf32>
    %cst_50 = arith.constant 0.000000e+00 : f32
    %cst_51 = arith.constant 1.000000e+00 : f32
    %111 = vector.broadcast %cst_50 : f32 to vector<8x8xf32>
    %112 = arith.maximumf %111, %110 : vector<8x8xf32>
    %113 = vector.broadcast %cst_51 : f32 to vector<8x8xf32>
    %114 = arith.minimumf %113, %112 : vector<8x8xf32>
    %115 = math.sqrt %114 : vector<8x8xf32>
    %cst_52 = arith.constant 0.87758255 : f32
    %116 = vector.broadcast %cst_52 : f32 to vector<8x8xf32>
    %117 = arith.mulf %107, %116 : vector<8x8xf32>
    %cst_53 = arith.constant 0.47942555 : f32
    %118 = vector.broadcast %cst_53 : f32 to vector<8x8xf32>
    %119 = arith.mulf %115, %118 : vector<8x8xf32>
    %120 = arith.subf %117, %119 : vector<8x8xf32>
    %cst_54 = arith.constant -0.87758255 : f32
    %121 = vector.broadcast %cst_54 : f32 to vector<8x8xf32>
    %122 = arith.cmpf ogt, %107, %121 : vector<8x8xf32>
    %cst_55 = arith.constant 0.239712775 : f32
    %123 = vector.broadcast %cst_55 : f32 to vector<8x8xf32>
    %124 = arith.subf %107, %123 : vector<8x8xf32>
    %125 = arith.select %122, %120, %124 : vector<8x8xi1>, vector<8x8xf32>
    %cst_56 = arith.constant 2.000000e+01 : f32
    %126 = vector.broadcast %cst_56 : f32 to vector<8x8xf32>
    %127 = arith.mulf %126, %125 : vector<8x8xf32>
    %128 = tpu.iota {dimensions = array<i32: 1>} : vector<8x8xi32>
    %129 = vector.extract_strided_slice %105 {offsets = [0, 0, 0], sizes = [8, 1, 32], strides = [1, 1, 1]} : vector<8x8x32xf32> to vector<8x1x32xf32>
    %130 = vector.broadcast %129 : vector<8x1x32xf32> to vector<8x8x32xf32>
    %131 = arith.mulf %97, %130 : vector<8x8x32xf32>
    %cst_57 = arith.constant dense<0.000000e+00> : vector<8x8xf32>
    %132 = vector.multi_reduction <add>, %131, %cst_57 [2] : vector<8x8x32xf32> to vector<8x8xf32>
    %c0_i32_58 = arith.constant 0 : i32
    %133 = vector.broadcast %c0_i32_58 : i32 to vector<8x8xi32>
    %134 = arith.cmpi eq, %128, %133 : vector<8x8xi32>
    %cst_59 = arith.constant 2.000000e+01 : f32
    %135 = vector.broadcast %cst_59 : f32 to vector<8x8xf32>
    %136 = arith.mulf %135, %132 : vector<8x8xf32>
    %137 = arith.select %134, %127, %136 : vector<8x8xi1>, vector<8x8xf32>
    %138 = vector.extract_strided_slice %105 {offsets = [0, 1, 0], sizes = [8, 1, 32], strides = [1, 1, 1]} : vector<8x8x32xf32> to vector<8x1x32xf32>
    %139 = vector.broadcast %138 : vector<8x1x32xf32> to vector<8x8x32xf32>
    %140 = arith.mulf %97, %139 : vector<8x8x32xf32>
    %cst_60 = arith.constant dense<0.000000e+00> : vector<8x8xf32>
    %141 = vector.multi_reduction <add>, %140, %cst_60 [2] : vector<8x8x32xf32> to vector<8x8xf32>
    %c1_i32_61 = arith.constant 1 : i32
    %142 = vector.broadcast %c1_i32_61 : i32 to vector<8x8xi32>
    %143 = arith.cmpi eq, %128, %142 : vector<8x8xi32>
    %cst_62 = arith.constant 2.000000e+01 : f32
    %144 = vector.broadcast %cst_62 : f32 to vector<8x8xf32>
    %145 = arith.mulf %144, %141 : vector<8x8xf32>
    %146 = arith.select %143, %127, %145 : vector<8x8xi1>, vector<8x8xf32>
    %147 = vector.extract_strided_slice %105 {offsets = [0, 2, 0], sizes = [8, 1, 32], strides = [1, 1, 1]} : vector<8x8x32xf32> to vector<8x1x32xf32>
    %148 = vector.broadcast %147 : vector<8x1x32xf32> to vector<8x8x32xf32>
    %149 = arith.mulf %97, %148 : vector<8x8x32xf32>
    %cst_63 = arith.constant dense<0.000000e+00> : vector<8x8xf32>
    %150 = vector.multi_reduction <add>, %149, %cst_63 [2] : vector<8x8x32xf32> to vector<8x8xf32>
    %c2_i32_64 = arith.constant 2 : i32
    %151 = vector.broadcast %c2_i32_64 : i32 to vector<8x8xi32>
    %152 = arith.cmpi eq, %128, %151 : vector<8x8xi32>
    %cst_65 = arith.constant 2.000000e+01 : f32
    %153 = vector.broadcast %cst_65 : f32 to vector<8x8xf32>
    %154 = arith.mulf %153, %150 : vector<8x8xf32>
    %155 = arith.select %152, %127, %154 : vector<8x8xi1>, vector<8x8xf32>
    %156 = vector.extract_strided_slice %105 {offsets = [0, 3, 0], sizes = [8, 1, 32], strides = [1, 1, 1]} : vector<8x8x32xf32> to vector<8x1x32xf32>
    %157 = vector.broadcast %156 : vector<8x1x32xf32> to vector<8x8x32xf32>
    %158 = arith.mulf %97, %157 : vector<8x8x32xf32>
    %cst_66 = arith.constant dense<0.000000e+00> : vector<8x8xf32>
    %159 = vector.multi_reduction <add>, %158, %cst_66 [2] : vector<8x8x32xf32> to vector<8x8xf32>
    %c3_i32_67 = arith.constant 3 : i32
    %160 = vector.broadcast %c3_i32_67 : i32 to vector<8x8xi32>
    %161 = arith.cmpi eq, %128, %160 : vector<8x8xi32>
    %cst_68 = arith.constant 2.000000e+01 : f32
    %162 = vector.broadcast %cst_68 : f32 to vector<8x8xf32>
    %163 = arith.mulf %162, %159 : vector<8x8xf32>
    %164 = arith.select %161, %127, %163 : vector<8x8xi1>, vector<8x8xf32>
    %165 = vector.extract_strided_slice %105 {offsets = [0, 4, 0], sizes = [8, 1, 32], strides = [1, 1, 1]} : vector<8x8x32xf32> to vector<8x1x32xf32>
    %166 = vector.broadcast %165 : vector<8x1x32xf32> to vector<8x8x32xf32>
    %167 = arith.mulf %97, %166 : vector<8x8x32xf32>
    %cst_69 = arith.constant dense<0.000000e+00> : vector<8x8xf32>
    %168 = vector.multi_reduction <add>, %167, %cst_69 [2] : vector<8x8x32xf32> to vector<8x8xf32>
    %c4_i32_70 = arith.constant 4 : i32
    %169 = vector.broadcast %c4_i32_70 : i32 to vector<8x8xi32>
    %170 = arith.cmpi eq, %128, %169 : vector<8x8xi32>
    %cst_71 = arith.constant 2.000000e+01 : f32
    %171 = vector.broadcast %cst_71 : f32 to vector<8x8xf32>
    %172 = arith.mulf %171, %168 : vector<8x8xf32>
    %173 = arith.select %170, %127, %172 : vector<8x8xi1>, vector<8x8xf32>
    %174 = vector.extract_strided_slice %105 {offsets = [0, 5, 0], sizes = [8, 1, 32], strides = [1, 1, 1]} : vector<8x8x32xf32> to vector<8x1x32xf32>
    %175 = vector.broadcast %174 : vector<8x1x32xf32> to vector<8x8x32xf32>
    %176 = arith.mulf %97, %175 : vector<8x8x32xf32>
    %cst_72 = arith.constant dense<0.000000e+00> : vector<8x8xf32>
    %177 = vector.multi_reduction <add>, %176, %cst_72 [2] : vector<8x8x32xf32> to vector<8x8xf32>
    %c5_i32_73 = arith.constant 5 : i32
    %178 = vector.broadcast %c5_i32_73 : i32 to vector<8x8xi32>
    %179 = arith.cmpi eq, %128, %178 : vector<8x8xi32>
    %cst_74 = arith.constant 2.000000e+01 : f32
    %180 = vector.broadcast %cst_74 : f32 to vector<8x8xf32>
    %181 = arith.mulf %180, %177 : vector<8x8xf32>
    %182 = arith.select %179, %127, %181 : vector<8x8xi1>, vector<8x8xf32>
    %183 = vector.extract_strided_slice %105 {offsets = [0, 6, 0], sizes = [8, 1, 32], strides = [1, 1, 1]} : vector<8x8x32xf32> to vector<8x1x32xf32>
    %184 = vector.broadcast %183 : vector<8x1x32xf32> to vector<8x8x32xf32>
    %185 = arith.mulf %97, %184 : vector<8x8x32xf32>
    %cst_75 = arith.constant dense<0.000000e+00> : vector<8x8xf32>
    %186 = vector.multi_reduction <add>, %185, %cst_75 [2] : vector<8x8x32xf32> to vector<8x8xf32>
    %c6_i32_76 = arith.constant 6 : i32
    %187 = vector.broadcast %c6_i32_76 : i32 to vector<8x8xi32>
    %188 = arith.cmpi eq, %128, %187 : vector<8x8xi32>
    %cst_77 = arith.constant 2.000000e+01 : f32
    %189 = vector.broadcast %cst_77 : f32 to vector<8x8xf32>
    %190 = arith.mulf %189, %186 : vector<8x8xf32>
    %191 = arith.select %188, %127, %190 : vector<8x8xi1>, vector<8x8xf32>
    %192 = vector.extract_strided_slice %105 {offsets = [0, 7, 0], sizes = [8, 1, 32], strides = [1, 1, 1]} : vector<8x8x32xf32> to vector<8x1x32xf32>
    %193 = vector.broadcast %192 : vector<8x1x32xf32> to vector<8x8x32xf32>
    %194 = arith.mulf %97, %193 : vector<8x8x32xf32>
    %cst_78 = arith.constant dense<0.000000e+00> : vector<8x8xf32>
    %195 = vector.multi_reduction <add>, %194, %cst_78 [2] : vector<8x8x32xf32> to vector<8x8xf32>
    %c7_i32_79 = arith.constant 7 : i32
    %196 = vector.broadcast %c7_i32_79 : i32 to vector<8x8xi32>
    %197 = arith.cmpi eq, %128, %196 : vector<8x8xi32>
    %cst_80 = arith.constant 2.000000e+01 : f32
    %198 = vector.broadcast %cst_80 : f32 to vector<8x8xf32>
    %199 = arith.mulf %198, %195 : vector<8x8xf32>
    %200 = arith.select %197, %127, %199 : vector<8x8xi1>, vector<8x8xf32>
    %201 = arith.maximumf %137, %146 : vector<8x8xf32>
    %202 = arith.maximumf %201, %155 : vector<8x8xf32>
    %203 = arith.maximumf %202, %164 : vector<8x8xf32>
    %204 = arith.maximumf %203, %173 : vector<8x8xf32>
    %205 = arith.maximumf %204, %182 : vector<8x8xf32>
    %206 = arith.maximumf %205, %191 : vector<8x8xf32>
    %207 = arith.maximumf %206, %200 : vector<8x8xf32>
    %cst_81 = arith.constant 0.000000e+00 : f32
    %208 = vector.broadcast %cst_81 : f32 to vector<8x8xf32>
    %209 = arith.subf %137, %207 : vector<8x8xf32>
    %210 = math.exp %209 : vector<8x8xf32>
    %211 = arith.addf %208, %210 : vector<8x8xf32>
    %212 = arith.subf %146, %207 : vector<8x8xf32>
    %213 = math.exp %212 : vector<8x8xf32>
    %214 = arith.addf %211, %213 : vector<8x8xf32>
    %215 = arith.subf %155, %207 : vector<8x8xf32>
    %216 = math.exp %215 : vector<8x8xf32>
    %217 = arith.addf %214, %216 : vector<8x8xf32>
    %218 = arith.subf %164, %207 : vector<8x8xf32>
    %219 = math.exp %218 : vector<8x8xf32>
    %220 = arith.addf %217, %219 : vector<8x8xf32>
    %221 = arith.subf %173, %207 : vector<8x8xf32>
    %222 = math.exp %221 : vector<8x8xf32>
    %223 = arith.addf %220, %222 : vector<8x8xf32>
    %224 = arith.subf %182, %207 : vector<8x8xf32>
    %225 = math.exp %224 : vector<8x8xf32>
    %226 = arith.addf %223, %225 : vector<8x8xf32>
    %227 = arith.subf %191, %207 : vector<8x8xf32>
    %228 = math.exp %227 : vector<8x8xf32>
    %229 = arith.addf %226, %228 : vector<8x8xf32>
    %230 = arith.subf %200, %207 : vector<8x8xf32>
    %231 = math.exp %230 : vector<8x8xf32>
    %232 = arith.addf %229, %231 : vector<8x8xf32>
    %233 = math.log %232 : vector<8x8xf32>
    %234 = arith.addf %207, %233 : vector<8x8xf32>
    %235 = arith.subf %234, %127 : vector<8x8xf32>
    %c8_i32_82 = arith.constant 8 : i32
    %236 = arith.muli %arg0, %c8_i32_82 : i32
    %237 = tpu.iota {dimensions = array<i32: 0>} : vector<8x8xi32>
    %238 = vector.broadcast %236 : i32 to vector<8x8xi32>
    %239 = arith.addi %238, %237 : vector<8x8xi32>
    %c2_i32_83 = arith.constant 2 : i32
    %240 = vector.broadcast %c2_i32_83 : i32 to vector<8x8xi32>
    %241 = arith.cmpi slt, %239, %240 : vector<8x8xi32>
    %cst_84 = arith.constant 0.000000e+00 : f32
    %242 = vector.broadcast %cst_84 : f32 to vector<8x8xf32>
    %243 = arith.select %241, %235, %242 : vector<8x8xi1>, vector<8x8xf32>
    %244 = vector.shape_cast %243 : vector<8x8xf32> to vector<1x8x8xf32>
    %cst_85 = arith.constant dense<0.000000e+00> : vector<1xf32>
    %245 = vector.multi_reduction <add>, %244, %cst_85 [1, 2] : vector<1x8x8xf32> to vector<1xf32>
    %246 = vector.shape_cast %245 : vector<1xf32> to vector<1x1x1xf32>
    %247 = vector.extract %246[0, 0, 0] : f32 from vector<1x1x1xf32>
    %248 = vector.broadcast %247 : f32 to vector<1x8x128xf32>
    %c0_86 = arith.constant 0 : index
    %c0_87 = arith.constant 0 : index
    %c0_88 = arith.constant 0 : index
    %249 = vector.load %arg4[%c0_86, %c0_87, %c0_88] : memref<1x8x128xf32, #tpu.memory_space<vmem>>, vector<1x8x128xf32>
    tpu.vector_store %arg4[%c0_86, %c0_87, %c0_88], %248 {strides = array<i32>} : memref<1x8x128xf32, #tpu.memory_space<vmem>>, vector<1x8x128xf32>,
    return
  }
  func.func @transform_0(%arg0: i32, %arg1: memref<8xi32, #tpu.memory_space<smem>>) -> (i32, i32, i32) {
    %c0_i32 = arith.constant 0 : i32
    %c0_i32_0 = arith.constant 0 : i32
    %c0_i32_1 = arith.constant 0 : i32
    return %arg0, %c0_i32, %c0_i32_0 : i32, i32, i32
  }
  func.func @transform_1(%arg0: i32, %arg1: memref<8xi32, #tpu.memory_space<smem>>) -> (i32, i32) {
    %c0_i32 = arith.constant 0 : i32
    %c0_i32_0 = arith.constant 0 : i32
    %c0_i32_1 = arith.constant 0 : i32
    return %c0_i32, %c0_i32_0 : i32, i32
  }
  func.func @transform_2(%arg0: i32, %arg1: memref<8xi32, #tpu.memory_space<smem>>) -> (i32, i32, i32) {
    %c0_i32 = arith.constant 0 : i32
    %c0_i32_0 = arith.constant 0 : i32
    %c0_i32_1 = arith.constant 0 : i32
    return %arg0, %c0_i32, %c0_i32_0 : i32, i32, i32
  }
}

</mosaic_0001>

<bundles_post_ra>
// kernel: tpu_custom_call.1
= control target key start
LH: loop header
LB: loop body
LE: loop exit
PB: predicated region body
PF: predicated region fallthrough
CT: control target
= control target key end

     0   :  { %s1798_s15 = smov [#allocation4]   ;;  %s3216_s0 = inlined_call_operand.hbm [shape: s32[8], index: 0, kind: input, shape index: {}]   ;;  %s3217_s1 = inlined_call_operand.hbm [shape: f32[8,8,32], index: 1, kind: input, shape index: {}]   ;;  %s3218_s2 = inlined_call_operand.hbm [shape: f32[32,32], index: 2, kind: input, shape index: {}]   ;;  %s3219_s3 = inlined_call_operand.hbm [shape: f32[1,8,128], index: 3, kind: output, shape index: {}]  }
   0x1   :  { %s9_s14 = sshll.u32 %s3216_s0, 4  ;;  %s10_s14 = int_to_ptr.hbm [resolvable:$true] %s9_s14 }
   0x2   :  { %12 = dma.hbm_to_smem %s10_s14, 16, %s1798_s15, [#allocation3] }
   0x3   :  { %1790 = dma.done.wait [#allocation3], 16 }
   0x4   :  { %1791 = vsyncadd [#allocation3], 4294967280 }
   0x5   :  { %15 = sfence }
   0x6   :  { %16 = vsyncpa [#allocation6], 0 }
   0x7   :  { %17 = vsyncpa [#allocation9], 0 }
   0x8   :  { %18 = vsyncpa [#allocation7], 0  ;;  %s23_s18 = sshll.u32 %s3217_s1, 4  ;;  %s1799_s19 = smov [#allocation5]   ;;  %s24_s18 = int_to_ptr.hbm [resolvable:$true] %s23_s18 }
   0x9   :  { %s25_s20 = sshll.u32 %s1799_s19, 4  ;;  %s36_s0 = sshll.u32 %s3218_s2, 4  ;;  %s26_s20 = int_to_ptr.vmem [resolvable:$true] %s25_s20  ;;  %s37_s0 = int_to_ptr.hbm [resolvable:$true] %s36_s0 }
   0xa   :  { %s1800_s23 = smov 128   ;;  %s1801_s24 = smov 8  }
   0xb   :  { %31 = dma.hbm_to_vmem [thread:$0]  %s24_s18, 1024, %s26_s20, [#allocation6], %s1800_s23, %s1800_s23, %s1801_s24  }
   0xc   :  { %s1802_s25 = smov [#allocation8]  }
   0xd   :  { %s38_s26 = sshll.u32 %s1802_s25, 4  ;;  %s39_s26 = int_to_ptr.vmem [resolvable:$true] %s38_s26 }
   0xe   :  { %44 = dma.hbm_to_vmem [thread:$0]  %s37_s0, 512, %s39_s26, [#allocation9], %s1800_s23, %s1800_s23, %s1801_s24  }
   0xf   :  { %1792 = dma.done.wait [#allocation6], 1024  }
  0x10   :  { %1793 = vsyncadd [#allocation6], 4294966272 }
  0x11   :  { %1794 = dma.done.wait [#allocation9], 512  }
  0x12   :  { %1795 = vsyncadd [#allocation9], 4294966784  ;;  %s54_s1 = sld [smem:[#allocation4]]  ;;  %vm58_vm0 = vcmask 261120   ;;  %v1839_v0 = vld [vmem:[#allocation5 + $0x10] sm:$0xff]  ;;  %v1841_v1 = vld [vmem:[#allocation5] sm:$0xff] }
  0x13   :  { %s1577_s27 = sld [smem:[#allocation4 + $0x2]]  ;;  %v127_v2 = vmul.f32 %v1839_v0, %v1839_v0  ;;  %v125_v3 = vmul.f32 %v1841_v1, %v1841_v1  ;;  %v1849_v4 = vld [vmem:[#allocation5 + $0x20] sm:$0xff]  ;;  %v1851_v5 = vld [vmem:[#allocation5 + $0x8] sm:$0xff]  ;;  %v1873_v20 = vld [vmem:[#allocation5 + $0x18] sm:$0xff]  ;;  %s1547_s23 = sshll.u32 %s3219_s3, 4  ;;  %s1548_s23 = int_to_ptr.hbm [resolvable:$true] %s1547_s23 }
  0x14   :  { %s1575_s28 = sld [smem:[#allocation4 + $0x1]]  ;;  %v129_v11 = vmul.f32 %v1849_v4, %v1849_v4  ;;  %v126_v12 = vmul.f32 %v1851_v5, %v1851_v5  ;;  %v128_v25 = vmul.f32 %v1873_v20, %v1873_v20  ;;  %v115_v40 = vld [vmem:[#allocation5 + $0x30] sm:$0xff]  ;;  %v116_v41 = vld [vmem:[#allocation5 + $0x38] sm:$0xff]  ;;  %v1908_v43 = vld [vmem:[#allocation5 + $0x28] sm:$0xff]  ;;  %s1803_s24 = smov [#allocation10]  }
  0x15   :  { %s1833_s29 = sld [smem:[#allocation4 + $0x4]]  ;;  %v139_v7 = vsel %vm58_vm0, %v127_v2, 0.0  ;;  %v133_v8 = vsel %vm58_vm0, %v125_v3, 0.0  ;;  %v131_v44 = vmul.f32 %v115_v40, %v115_v40  ;;  %v132_v45 = vmul.f32 %v116_v41, %v116_v41  ;;  %s1545_s25 = sshll.u32 %s1803_s24, 4  ;;  %s1546_s25 = int_to_ptr.vmem [resolvable:$true] %s1545_s25 }
  0x16   :  { %s1835_s30 = sld [smem:[#allocation4 + $0x5]]  ;;  %140 = vadd.xlane.f32.xlu2 %v139_v7  ;;  %134 = vadd.xlane.f32.xlu0 %v133_v8  ;;  %v145_v17 = vsel %vm58_vm0, %v129_v11, 0.0  ;;  %v136_v18 = vsel %vm58_vm0, %v126_v12, 0.0  ;;  %v142_v29 = vsel %vm58_vm0, %v128_v25, 0.0  ;;  %v130_v46 = vmul.f32 %v1908_v43, %v1908_v43 }
  0x17   :  { %s1837_s2 = sld [smem:[#allocation4 + $0x3]]  ;;  %v151_v47 = vsel %vm58_vm0, %v131_v44, 0.0  ;;  %v154_v48 = vsel %vm58_vm0, %v132_v45, 0.0 }
  0x18   :  { %s1574_s4 = sshll.u32 %s54_s1, 3  ;;  %s1843_s5 = sld [smem:[#allocation4 + $0x7]]  ;;  %v148_v50 = vsel %vm58_vm0, %v130_v46, 0.0 }
  0x19   :  { %s1578_s6 = sshll.u32 %s1577_s27, 3  ;;  %s56_s7 = scalar_lea.vmem [#allocation8], %s1574_s4 }
  0x1a   :  { %v57_v6 = vld [vmem:[%s56_s7] sm:$0xff]  ;;  %s1576_s8 = sshll.u32 %s1575_s28, 3  ;;  %s70_s9 = scalar_lea.vmem [#allocation8], %s1578_s6 }
  0x1b   :  { %59 = vst.msk [vmem:[#allocation2] sm:$0xff] %vm58_vm0, %v57_v6  ;;  %v71_v9 = vld [vmem:[%s70_s9] sm:$0xff]  ;;  %s63_s10 = scalar_lea.vmem [#allocation8], %s1576_s8  ;;  %s1582_s11 = sshll.u32 %s1833_s29, 3 }
  0x1c   :  { %73 = vst.msk [vmem:[#allocation2 + $0x10] sm:$0xff] %vm58_vm0, %v71_v9  ;;  %v64_v10 = vld [vmem:[%s63_s10] sm:$0xff]  ;;  %s1584_s12 = sshll.u32 %s1835_s30, 3  ;;  %s84_s13 = scalar_lea.vmem [#allocation8], %s1582_s11 }
  0x1d   :  { %66 = vst.msk [vmem:[#allocation2 + $0x8] sm:$0xff] %vm58_vm0, %v64_v10  ;;  %v85_v13 = vld [vmem:[%s84_s13] sm:$0xff]  ;;  %s91_s14 = scalar_lea.vmem [#allocation8], %s1584_s12  ;;  %s1580_s15 = sshll.u32 %s1837_s2, 3 }
  0x1e   :  { %v92_v14 = vld [vmem:[%s91_s14] sm:$0xff]  ;;  %s1588_s16 = sshll.u32 %s1843_s5, 3  ;;  %87 = vst.msk [vmem:[#allocation2 + $0x20] sm:$0xff] %vm58_vm0, %v85_v13  ;;  %s77_s17 = scalar_lea.vmem [#allocation8], %s1580_s15  ;;  %146 = vadd.xlane.f32.xlu2 %v145_v17  ;;  %137 = vadd.xlane.f32.xlu0 %v136_v18 }
  0x1f   :  { %94 = vst.msk [vmem:[#allocation2 + $0x28] sm:$0xff] %vm58_vm0, %v92_v14  ;;  %v78_v15 = vld [vmem:[%s77_s17] sm:$0xff]  ;;  %s105_s18 = scalar_lea.vmem [#allocation8], %s1588_s16  ;;  %s1585_s19 = sld [smem:[#allocation4 + $0x6]] }
  0x20   :  { %v106_v16 = vld [vmem:[%s105_s18] sm:$0xff]  ;;  %80 = vst.msk [vmem:[#allocation2 + $0x18] sm:$0xff] %vm58_vm0, %v78_v15 }
  0x21   :  { %108 = vst.msk [vmem:[#allocation2 + $0x38] sm:$0xff] %vm58_vm0, %v106_v16 }
  0x22   :  { %v1871_v19 = vld [vmem:[#allocation2] sm:$0xff] }
  0x23   :  { %v381_v21 = vmul.f32 %v1871_v19, %v1871_v19  ;;  %v1878_v22 = vld [vmem:[#allocation2 + $0x10] sm:$0xff] }
  0x24   :  { %v1880_v23 = vld [vmem:[#allocation2 + $0x8] sm:$0xff]  ;;  %v383_v26 = vmul.f32 %v1878_v22, %v1878_v22 }
  0x25   :  { %v389_v24 = vsel %vm58_vm0, %v381_v21, 0.0  ;;  %s1586_s20 = sshll.u32 %s1585_s19, 3  ;;  %v382_v27 = vmul.f32 %v1880_v23, %v1880_v23  ;;  %v1892_v31 = vld [vmem:[#allocation2 + $0x20] sm:$0xff] }
  0x26   :  { %390 = vadd.xlane.f32.xlu1 %v389_v24  ;;  %s98_s21 = scalar_lea.vmem [#allocation8], %s1586_s20  ;;  %v395_v30 = vsel %vm58_vm0, %v383_v26, 0.0  ;;  %v1894_v32 = vld [vmem:[#allocation2 + $0x28] sm:$0xff]  ;;  %143 = vadd.xlane.f32.xlu0 %v142_v29  ;;  %v385_v35 = vmul.f32 %v1892_v31, %v1892_v31 }
  0x27   :  { %v99_v28 = vld [vmem:[%s98_s21] sm:$0xff]  ;;  %v392_v33 = vsel %vm58_vm0, %v382_v27, 0.0  ;;  %396 = vadd.xlane.f32.xlu2 %v395_v30  ;;  %v1897_v34 = vld [vmem:[#allocation2 + $0x18] sm:$0xff]  ;;  %v386_v36 = vmul.f32 %v1894_v32, %v1894_v32 }
  0x28   :  { %101 = vst.msk [vmem:[#allocation2 + $0x30] sm:$0xff] %vm58_vm0, %v99_v28  ;;  %v384_v37 = vmul.f32 %v1897_v34, %v1897_v34  ;;  %v401_v38 = vsel %vm58_vm0, %v385_v35, 0.0  ;;  %v1914_v49 = vld [vmem:[#allocation2 + $0x38] sm:$0xff] }
  0x29   :  { %v404_v39 = vsel %vm58_vm0, %v386_v36, 0.0  ;;  %v388_v52 = vmul.f32 %v1914_v49, %v1914_v49 }
  0x2a   :  { %v398_v42 = vsel %vm58_vm0, %v384_v37, 0.0 }
  0x2b   :  { %v410_v54 = vsel %vm58_vm0, %v388_v52, 0.0 }
  0x2e   :  { %393 = vadd.xlane.f32.xlu1 %v392_v33  ;;  %402 = vadd.xlane.f32.xlu0 %v401_v38 }
  0x2f   :  { %405 = vadd.xlane.f32.xlu2 %v404_v39  ;;  %v123_v51 = vld [vmem:[#allocation2 + $0x30] sm:$0xff] }
  0x30   :  { %v387_v53 = vmul.f32 %v123_v51, %v123_v51 }
  0x32   :  { %v407_v55 = vsel %vm58_vm0, %v387_v53, 0.0 }
  0x36   :  { %399 = vadd.xlane.f32.xlu1 %v398_v42  ;;  %152 = vadd.xlane.f32.xlu0 %v151_v47 }
  0x37   :  { %155 = vadd.xlane.f32.xlu2 %v154_v48 }
  0x3e   :  { %149 = vadd.xlane.f32.xlu1 %v148_v50  ;;  %411 = vadd.xlane.f32.xlu0 %v410_v54 }
  0x46   :  { %408 = vadd.xlane.f32.xlu1 %v407_v55 }
  0x89   :  { %v141_v56 = vpop.xlane.xlu2 %140  ;;  %v135_v57 = vpop.xlane.xlu0 %134 }
  0x8a   :  { %1605 = vrsqrt.f32 %v141_v56  ;;  %vm188_vm1 = vcmp.eq.f32.partialorder %v141_v56, inf  ;;  %v191_v27 = vand.u32 2147483648, %v141_v56  ;;  %vm164_vm2 = vcmp.eq.f32.partialorder %v135_v57, inf }
  0x8b   :  { %1607 = vrsqrt.f32 %v135_v57  ;;  %vm190_vm3 = vcmp.eq.f32.partialorder %v141_v56, 0.0  ;;  %v167_v37 = vand.u32 2147483648, %v135_v57  ;;  %vm166_vm4 = vcmp.eq.f32.partialorder %v135_v57, 0.0 }
  0x90   :  { %v1606_v58 = vpop.eup %1605 }
  0x91   :  { %v1608_v59 = vpop.eup %1607  ;;  %v182_v60 = vmul.f32 %v1606_v58, %v141_v56  ;;  %v1921_v61 = vpop.xlane.xlu2 %146 }
  0x92   :  { %v1923_v62 = vpop.xlane.xlu0 %137  ;;  %v158_v63 = vmul.f32 %v1608_v59, %v135_v57  ;;  %1609 = vrsqrt.f32 %v1921_v61  ;;  %vm212_vm5 = vcmp.eq.f32.partialorder %v1921_v61, inf  ;;  %vm214_vm6 = vcmp.eq.f32.partialorder %v1921_v61, 0.0 }
  0x93   :  { %v183_v2 = vmul.f32 %v1606_v58, %v182_v60  ;;  %1611 = vrsqrt.f32 %v1923_v62  ;;  %vm176_vm7 = vcmp.eq.f32.partialorder %v1923_v62, inf  ;;  %vm178_vm8 = vcmp.eq.f32.partialorder %v1923_v62, 0.0 }
  0x94   :  { %v159_v6 = vmul.f32 %v1608_v59, %v158_v63 }
  0x95   :  { %v184_v7 = vmul.f32 0.5, %v183_v2 }
  0x96   :  { %v160_v8 = vmul.f32 0.5, %v159_v6  ;;  %v179_v6 = vand.u32 2147483648, %v1923_v62 }
  0x97   :  { %v185_v9 = vsub.f32 1.5, %v184_v7 }
  0x98   :  { %v1610_v10 = vpop.eup %1609  ;;  %v161_v11 = vsub.f32 1.5, %v160_v8 }
  0x99   :  { %v1927_v3 = vpop.xlane.xlu1 %390  ;;  %v1612_v12 = vpop.eup %1611  ;;  %v186_v13 = vmul.f32 %v1606_v58, %v185_v9  ;;  %v206_v14 = vmul.f32 %v1610_v10, %v1921_v61 }
  0x9a   :  { %1613 = vrsqrt.f32 %v1927_v3  ;;  %v1931_v15 = vpop.xlane.xlu0 %143  ;;  %v1933_v16 = vpop.xlane.xlu2 %396  ;;  %v162_v18 = vmul.f32 %v1608_v59, %v161_v11  ;;  %v170_v21 = vmul.f32 %v1612_v12, %v1923_v62  ;;  %vm420_vm9 = vcmp.eq.f32.partialorder %v1927_v3, inf }
  0x9b   :  { %v187_v24 = vmul.f32 %v186_v13, %v141_v56  ;;  %v207_v25 = vmul.f32 %v1610_v10, %v206_v14  ;;  %1615 = vrsqrt.f32 %v1931_v15  ;;  %vm422_vm10 = vcmp.eq.f32.partialorder %v1927_v3, 0.0 }
  0x9c   :  { %v163_v28 = vmul.f32 %v162_v18, %v135_v57  ;;  %v171_v29 = vmul.f32 %v1612_v12, %v170_v21  ;;  %1617 = vrsqrt.f32 %v1933_v16  ;;  %vm200_vm11 = vcmp.eq.f32.partialorder %v1931_v15, inf }
  0x9d   :  { %v189_v30 = vsel %vm188_vm1, %v141_v56, %v187_v24  ;;  %v208_v33 = vmul.f32 0.5, %v207_v25  ;;  %v215_v56 = vand.u32 2147483648, %v1921_v61  ;;  %vm202_vm12 = vcmp.eq.f32.partialorder %v1931_v15, 0.0 }
  0x9e   :  { %v165_v36 = vsel %vm164_vm2, %v135_v57, %v163_v28  ;;  %v172_v38 = vmul.f32 0.5, %v171_v29  ;;  %v192_v39 = vsel %vm190_vm3, %v191_v27, %v189_v30  ;;  %vm444_vm13 = vcmp.eq.f32.partialorder %v1933_v16, inf }
  0x9f   :  { %v209_v40 = vsub.f32 1.5, %v208_v33  ;;  %v168_v41 = vsel %vm166_vm4, %v167_v37, %v165_v36  ;;  %v1941_v48 = vmax.f32 %v192_v39, 1e-12  ;;  %vm446_vm14 = vcmp.eq.f32.partialorder %v1933_v16, 0.0 }
  0xa0   :  { %v1614_v17 = vpop.eup %1613  ;;  %v173_v42 = vsub.f32 1.5, %v172_v38  ;;  %v1943_v50 = vmax.f32 %v168_v41, 1e-12  ;;  %v203_v38 = vand.u32 2147483648, %v1931_v15 }
  0xa1   :  { %v414_v26 = vmul.f32 %v1614_v17, %v1927_v3  ;;  %v1616_v45 = vpop.eup %1615  ;;  %v1939_v46 = vpop.xlane.xlu1 %393  ;;  %v210_v51 = vmul.f32 %v1610_v10, %v209_v40  ;;  %v300_v40 = vand.u32 2147483647, %v1941_v48  ;;  %vm296_vm15 = vweird.f32 %v1941_v48 }
  0xa2   :  { %v1618_v47 = vpop.eup %1617  ;;  %v174_v52 = vmul.f32 %v1612_v12, %v173_v42  ;;  %v194_v54 = vmul.f32 %v1616_v45, %v1931_v15  ;;  %1619 = vrsqrt.f32 %v1939_v46  ;;  %vm266_vm1 = vweird.f32 %v1943_v50 }
  0xa3   :  { %v415_v35 = vmul.f32 %v1614_v17, %v414_v26  ;;  %v211_v55 = vmul.f32 %v210_v51, %v1921_v61  ;;  %v438_v58 = vmul.f32 %v1618_v47, %v1933_v16  ;;  %1621 = vrcp.f32 %v1941_v48  ;;  %v1976_v26 = vpop.xlane.xlu0 %402 }
  0xa4   :  { %v175_v57 = vmul.f32 %v174_v52, %v1923_v62  ;;  %v195_v60 = vmul.f32 %v1616_v45, %v194_v54  ;;  %1623 = vrcp.f32 %v1943_v50  ;;  %v302_v51 = vand.u32 2147483648, %v1941_v48 }
  0xa5   :  { %v416_v44 = vmul.f32 0.5, %v415_v35  ;;  %v213_v63 = vsel %vm212_vm5, %v1921_v61, %v211_v55  ;;  %v439_v9 = vmul.f32 %v1618_v47, %v438_v58  ;;  %v423_v61 = vand.u32 2147483648, %v1927_v3 }
  0xa6   :  { %v177_v2 = vsel %vm176_vm7, %v1923_v62, %v175_v57  ;;  %v216_v7 = vsel %vm214_vm6, %v215_v56, %v213_v63  ;;  %v196_v12 = vmul.f32 0.5, %v195_v60  ;;  %v270_v52 = vand.u32 2147483647, %v1943_v50 }
  0xa7   :  { %v417_v53 = vsub.f32 1.5, %v416_v44  ;;  %v180_v8 = vsel %vm178_vm8, %v179_v6, %v177_v2  ;;  %v1963_v13 = vmax.f32 %v216_v7, 1e-12  ;;  %v440_v21 = vmul.f32 0.5, %v439_v9 }
  0xa8   :  { %v1620_v10 = vpop.eup %1619  ;;  %v197_v25 = vsub.f32 1.5, %v196_v12  ;;  %vm2012_vm2 = vcmp.eq.f32.partialorder %v300_v40, 8.507059e+37  ;;  %v303_v7 = vor.u32 1.1754944e-38, %v302_v51  ;;  %vm2021_vm3 = vcmp.eq.f32.partialorder %v270_v52, 8.507059e+37 }
  0xa9   :  { %v418_v59 = vmul.f32 %v1614_v17, %v417_v53  ;;  %v1965_v14 = vpop.eup %1621  ;;  %v1967_v17 = vmax.f32 %v180_v8, 1e-12  ;;  %v426_v62 = vmul.f32 %v1620_v10, %v1939_v46  ;;  %1625 = vrcp.f32 %v1963_v13  ;;  %v2081_v52 = vpop.xlane.xlu1 %399 }
  0xaa   :  { %v1969_v18 = vpop.eup %1623  ;;  %v292_v27 = vmul.f32 %v1965_v14, %v1941_v48  ;;  %v198_v30 = vmul.f32 %v1616_v45, %v197_v25  ;;  %v441_v33 = vsub.f32 1.5, %v440_v21  ;;  %v272_v53 = vand.u32 2147483648, %v1943_v50 }
  0xab   :  { %v419_v11 = vmul.f32 %v418_v59, %v1927_v3  ;;  %v262_v29 = vmul.f32 %v1969_v18, %v1943_v50  ;;  %1627 = vrcp.f32 %v1967_v17  ;;  %v427_v35 = vmul.f32 %v1620_v10, %v426_v62 }
  0xac   :  { %1629 = vrsqrt.f32 %v1976_v26  ;;  %v293_v36 = vsub.f32 1.0, %v292_v27  ;;  %v199_v41 = vmul.f32 %v198_v30, %v1931_v15  ;;  %v442_v42 = vmul.f32 %v1618_v47, %v441_v33 }
  0xad   :  { %v421_v24 = vsel %vm420_vm9, %v1927_v3, %v419_v11  ;;  %v263_v37 = vsub.f32 1.0, %v262_v29  ;;  %v428_v44 = vmul.f32 0.5, %v427_v35  ;;  %v447_v47 = vand.u32 2147483648, %v1933_v16  ;;  %v2053_v35 = vpop.xlane.xlu2 %405 }
  0xae   :  { %v424_v28 = vsel %vm422_vm10, %v423_v61, %v421_v24  ;;  %v294_v55 = vmul.f32 %v1965_v14, %v293_v36  ;;  %v443_v56 = vmul.f32 %v442_v42, %v1933_v16  ;;  %v201_v2 = vsel %vm200_vm11, %v1931_v15, %v199_v41 }
  0xaf   :  { %v1985_v3 = vmax.f32 %v424_v28, 1e-12  ;;  %v1991_v39 = vpop.eup %1625  ;;  %v429_v57 = vsub.f32 1.5, %v428_v44  ;;  %v264_v58 = vmul.f32 %v1969_v18, %v263_v37  ;;  %v273_v9 = vor.u32 1.1754944e-38, %v272_v53 }
  0xb0   :  { %v322_v59 = vmul.f32 %v1991_v39, %v1963_v13  ;;  %v295_v12 = vadd.f32 %v1965_v14, %v294_v55  ;;  %vm297_vm4 = vweird.f32 %v1965_v14  ;;  %v445_v61 = vsel %vm444_vm13, %v1933_v16, %v443_v56 }
  0xb1   :  { %v1996_v45 = vpop.eup %1627  ;;  %1631 = vrcp.f32 %v1985_v3  ;;  %v430_v6 = vmul.f32 %v1620_v10, %v429_v57  ;;  %vm432_vm5 = vcmp.eq.f32.partialorder %v1939_v46, inf  ;;  %v265_v21 = vadd.f32 %v1969_v18, %v264_v58  ;;  %vm2044_vm8 = vmor %vm296_vm15, %vm297_vm4  ;;  %v2196_v58 = vpop.xlane.xlu1 %149 }
  0xb2   :  { %v2002_v54 = vpop.eup %1629  ;;  %v277_v63 = vmul.f32 %v1996_v45, %v1967_v17  ;;  %vm267_vm6 = vweird.f32 %v1969_v18  ;;  %v323_v62 = vsub.f32 1.0, %v322_v59  ;;  %v204_v24 = vsel %vm202_vm12, %v203_v38, %v201_v2 }
  0xb3   :  { %v462_v11 = vmul.f32 %v2002_v54, %v1976_v26  ;;  %v431_v27 = vmul.f32 %v430_v6, %v1939_v46  ;;  %vm434_vm7 = vcmp.eq.f32.partialorder %v1939_v46, 0.0  ;;  %v435_v28 = vand.u32 2147483648, %v1939_v46  ;;  %vm2060_vm10 = vmor %vm266_vm1, %vm267_vm6 }
  0xb4   :  { %v278_v25 = vsub.f32 1.0, %v277_v63  ;;  %vm326_vm9 = vweird.f32 %v1963_v13  ;;  %v332_v30 = vand.u32 2147483648, %v1963_v13  ;;  %v448_v15 = vsel %vm446_vm14, %v447_v47, %v445_v61 }
  0xb5   :  { %v463_v33 = vmul.f32 %v2002_v54, %v462_v11  ;;  %v299_v36 = vsel %vm2044_vm8, %v1965_v14, %v295_v12  ;;  %v330_v37 = vand.u32 2147483647, %v1963_v13  ;;  %v2067_v38 = vmax.f32 %v204_v24, 1e-12 }
  0xb6   :  { %v269_v40 = vsel %vm2060_vm10, %v1969_v18, %v265_v21  ;;  %v324_v41 = vmul.f32 %v1991_v39, %v323_v62  ;;  %v285_v14 = vand.u32 2147483647, %v1967_v17  ;;  %v279_v42 = vmul.f32 %v1996_v45, %v278_v25 }
  0xb7   :  { %v2033_v10 = vpop.eup %1631  ;;  %v464_v50 = vmul.f32 0.5, %v463_v33  ;;  %v2075_v44 = vmax.f32 %v448_v15, 1e-12  ;;  %v433_v51 = vsel %vm432_vm5, %v1939_v46, %v431_v27  ;;  %1633 = vrsqrt.f32 %v2053_v35  ;;  %v2151_v33 = vpop.xlane.xlu2 %155 }
  0xb8   :  { %v518_v16 = vmul.f32 %v2033_v10, %v1985_v3  ;;  %v304_v18 = vsel %vm2012_vm2, %v303_v7, %v299_v36  ;;  %v333_v53 = vor.u32 1.1754944e-38, %v332_v30  ;;  %vm281_vm11 = vweird.f32 %v1967_v17 }
  0xb9   :  { %v287_v55 = vand.u32 2147483648, %v1967_v17  ;;  %v274_v56 = vsel %vm2021_vm3, %v273_v9, %v269_v40  ;;  %1635 = vrcp.f32 %v2067_v38  ;;  %v465_v57 = vsub.f32 1.5, %v464_v50  ;;  %v2113_v9 = vpop.xlane.xlu0 %152 }
  0xba   :  { %v519_v47 = vsub.f32 1.0, %v518_v16  ;;  %vm327_vm12 = vweird.f32 %v1991_v39  ;;  %vm2091_vm13 = vcmp.eq.f32.partialorder %v285_v14, 8.507059e+37  ;;  %v436_v59 = vsel %vm434_vm7, %v435_v28, %v433_v51 }
  0xbb   :  { %1637 = vrsqrt.f32 %v2081_v52  ;;  %v325_v60 = vadd.f32 %v1991_v39, %v324_v41  ;;  %vm2099_vm14 = vcmp.eq.f32.partialorder %v330_v37, 8.507059e+37  ;;  %v280_v2 = vadd.f32 %v1996_v45, %v279_v42  ;;  %vm2119_vm1 = vmor %vm326_vm9, %vm327_vm12 }
  0xbc   :  { %vm282_vm15 = vweird.f32 %v1996_v45  ;;  %1639 = vrcp.f32 %v2075_v44  ;;  %v2107_v6 = vmul.f32 %v304_v18, %v1839_v0  ;;  %v2110_v46 = vmul.f32 %v274_v56, %v1841_v1 }
  0xbd   :  { %v288_v7 = vor.u32 1.1754944e-38, %v287_v55  ;;  %v466_v8 = vmul.f32 %v2002_v54, %v465_v57  ;;  %v1634_v11 = vpop.eup %1633  ;;  %v520_v0 = vmul.f32 %v2033_v10, %v519_v47  ;;  %v526_v61 = vand.u32 2147483647, %v1985_v3  ;;  %vm2130_vm2 = vmor %vm281_vm11, %vm282_vm15 }
  0xbe   :  { %v528_v1 = vand.u32 2147483648, %v1985_v3  ;;  %v2126_v21 = vmax.f32 %v436_v59, 1e-12  ;;  %vm468_vm3 = vcmp.eq.f32.partialorder %v1976_v26, inf  ;;  %vm470_vm4 = vcmp.eq.f32.partialorder %v1976_v26, 0.0 }
  0xbf   :  { %v467_v13 = vmul.f32 %v466_v8, %v1976_v26  ;;  %v474_v62 = vmul.f32 %v1634_v11, %v2053_v35  ;;  %v2138_v24 = vpop.eup %1635  ;;  %v329_v25 = vsel %vm2119_vm1, %v1991_v39, %v325_v60  ;;  %v284_v17 = vsel %vm2130_vm2, %v1996_v45, %v280_v2 }
  0xc0   :  { %v471_v27 = vand.u32 2147483648, %v1976_v26  ;;  %1641 = vrsqrt.f32 %v2113_v9  ;;  %vm523_vm5 = vweird.f32 %v2033_v10  ;;  %v317_v29 = vand.u32 2147483648, %v2067_v38 }
  0xc1   :  { %v1638_v28 = vpop.eup %1637  ;;  %v469_v30 = vsel %vm468_vm3, %v1976_v26, %v467_v13  ;;  %v475_v15 = vmul.f32 %v1634_v11, %v474_v62  ;;  %v521_v39 = vadd.f32 %v2033_v10, %v520_v0  ;;  %1643 = vrcp.f32 %v2126_v21  ;;  %v2214_v13 = vpop.xlane.xlu0 %411 }
  0xc2   :  { %v2153_v36 = vpop.eup %1639  ;;  %v472_v45 = vsel %vm470_vm4, %v471_v27, %v469_v30  ;;  %v450_v48 = vmul.f32 %v1638_v28, %v2081_v52  ;;  %v289_v37 = vsel %vm2091_vm13, %v288_v7, %v284_v17  ;;  %vm522_vm6 = vweird.f32 %v1985_v3 }
  0xc3   :  { %vm2163_vm7 = vcmp.eq.f32.partialorder %v526_v61, 8.507059e+37  ;;  %v307_v40 = vmul.f32 %v2138_v24, %v2067_v38  ;;  %v2169_v41 = vmax.f32 %v472_v45, 1e-12  ;;  %v476_v14 = vmul.f32 0.5, %v475_v15  ;;  %vm2178_vm8 = vmor %vm522_vm6, %vm523_vm5 }
  0xc4   :  { %v451_v50 = vmul.f32 %v1638_v28, %v450_v48  ;;  %1645 = vrsqrt.f32 %v2151_v33  ;;  %v2174_v26 = vsel %vm2099_vm14, %v333_v53, %v329_v25  ;;  %v529_v42 = vor.u32 1.1754944e-38, %v528_v1 }
  0xc5   :  { %v315_v51 = vand.u32 2147483647, %v2067_v38  ;;  %v548_v18 = vmul.f32 %v2153_v36, %v2075_v44  ;;  %v2188_v56 = vmul.f32 %v289_v37, %v1851_v5  ;;  %v525_v53 = vsel %vm2178_vm8, %v2033_v10, %v521_v39 }
  0xc6   :  { %v2185_v55 = vpop.eup %1641  ;;  %v2193_v47 = vor.u32 1.1754944e-38, %v317_v29  ;;  %v558_v57 = vand.u32 2147483648, %v2075_v44  ;;  %v308_v59 = vsub.f32 1.0, %v307_v40  ;;  %v556_v60 = vand.u32 2147483647, %v2075_v44 }
  0xc7   :  { %v477_v63 = vsub.f32 1.5, %v476_v14  ;;  %vm480_vm9 = vcmp.eq.f32.partialorder %v2053_v35, inf  ;;  %v2200_v2 = vpop.eup %1643  ;;  %vm312_vm10 = vweird.f32 %v2138_v24  ;;  %1647 = vrcp.f32 %v2169_v41 }
  0xc8   :  { %v452_v5 = vmul.f32 0.5, %v451_v50  ;;  %v230_v10 = vmul.f32 %v2185_v55, %v2113_v9  ;;  %v530_v7 = vsel %vm2163_vm7, %v529_v42, %v525_v53  ;;  %vm311_vm11 = vweird.f32 %v2067_v38 }
  0xc9   :  { %v549_v8 = vsub.f32 1.0, %v548_v18  ;;  %v478_v12 = vmul.f32 %v1634_v11, %v477_v63  ;;  %1649 = vrsqrt.f32 %v2196_v58  ;;  %v2210_v61 = vor.u32 1.1754944e-38, %v558_v57  ;;  %vm2264_vm4 = vmor %vm311_vm11, %vm312_vm10 }
  0xca   :  { %v1646_v0 = vpop.eup %1645  ;;  %vm482_vm12 = vcmp.eq.f32.partialorder %v2053_v35, 0.0  ;;  %v453_v1 = vsub.f32 1.5, %v452_v5  ;;  %v231_v54 = vmul.f32 %v2185_v55, %v230_v10  ;;  %v309_v62 = vmul.f32 %v2138_v24, %v308_v59 }
  0xcb   :  { %vm552_vm13 = vweird.f32 %v2075_v44  ;;  %v533_v25 = vmul.f32 %v2200_v2, %v2126_v21  ;;  %v479_v11 = vmul.f32 %v478_v12, %v2053_v35  ;;  %v242_v17 = vmul.f32 %v1646_v0, %v2151_v33 }
  0xcc   :  { %v2223_v27 = vmul.f32 %v530_v7, %v1871_v19  ;;  %v483_v29 = vand.u32 2147483648, %v2053_v35  ;;  %v454_v30 = vmul.f32 %v1638_v28, %v453_v1  ;;  %v232_v15 = vmul.f32 0.5, %v231_v54 }
  0xcd   :  { %vm2226_vm14 = vcmp.eq.f32.partialorder %v315_v51, 8.507059e+37  ;;  %v550_v45 = vmul.f32 %v2153_v36, %v549_v8  ;;  %v543_v48 = vand.u32 2147483648, %v2126_v21  ;;  %v481_v37 = vsel %vm480_vm9, %v2053_v35, %v479_v11  ;;  %v2236_v19 = vpop.eup %1647 }
  0xce   :  { %1651 = vrsqrt.f32 %v2214_v13  ;;  %v484_v28 = vsel %vm482_vm12, %v483_v29, %v481_v37  ;;  %v455_v16 = vmul.f32 %v454_v30, %v2081_v52  ;;  %v233_v40 = vsub.f32 1.5, %v232_v15 }
  0xcf   :  { %v243_v14 = vmul.f32 %v1646_v0, %v242_v17  ;;  %v2241_v50 = vpop.eup %1649  ;;  %v310_v3 = vadd.f32 %v2138_v24, %v309_v62  ;;  %vm2244_vm15 = vcmp.eq.f32.partialorder %v556_v60, 8.507059e+37  ;;  %v534_v51 = vsub.f32 1.0, %v533_v25 }
  0xd0   :  { %vm456_vm1 = vcmp.eq.f32.partialorder %v2081_v52, inf  ;;  %v459_v18 = vand.u32 2147483648, %v2081_v52  ;;  %v2250_v53 = vmax.f32 %v484_v28, 1e-12  ;;  %v218_v59 = vmul.f32 %v2241_v50, %v2196_v58 }
  0xd1   :  { %v457_v35 = vsel %vm456_vm1, %v2081_v52, %v455_v16  ;;  %v244_v57 = vmul.f32 0.5, %v243_v14  ;;  %v551_v63 = vadd.f32 %v2153_v36, %v550_v45  ;;  %vm553_vm2 = vweird.f32 %v2153_v36 }
  0xd2   :  { %v578_v60 = vmul.f32 %v2236_v19, %v2169_v41  ;;  %vm458_vm3 = vcmp.eq.f32.partialorder %v2081_v52, 0.0  ;;  %vm537_vm5 = vweird.f32 %v2126_v21  ;;  %v541_v10 = vand.u32 2147483647, %v2126_v21  ;;  %vm2283_vm6 = vmor %vm552_vm13, %vm553_vm2  ;;  %v2348_v21 = vpop.xlane.xlu1 %408 }
  0xd3   :  { %v460_v7 = vsel %vm458_vm3, %v459_v18, %v457_v35  ;;  %v234_v8 = vmul.f32 %v2185_v55, %v233_v40  ;;  %v245_v12 = vsub.f32 1.5, %v244_v57  ;;  %v314_v52 = vsel %vm2264_vm4, %v2138_v24, %v310_v3 }
  0xd4   :  { %v2271_v1 = vpop.eup %1651  ;;  %v2276_v54 = vor.u32 1.1754944e-38, %v543_v48  ;;  %v2278_v38 = vmax.f32 %v460_v7, 1e-12  ;;  %v219_v62 = vmul.f32 %v2241_v50, %v218_v59  ;;  %v535_v55 = vmul.f32 %v2200_v2, %v534_v51 }
  0xd5   :  { %1653 = vrcp.f32 %v2250_v53  ;;  %vm236_vm7 = vcmp.eq.f32.partialorder %v2113_v9, inf  ;;  %v246_v11 = vmul.f32 %v1646_v0, %v245_v12  ;;  %v555_v24 = vsel %vm2283_vm6, %v2153_v36, %v551_v63 }
  0xd6   :  { %v579_v17 = vsub.f32 1.0, %v578_v60  ;;  %1655 = vrcp.f32 %v2278_v38  ;;  %vm238_vm8 = vcmp.eq.f32.partialorder %v2113_v9, 0.0  ;;  %v319_v44 = vsel %vm2226_vm14, %v2193_v47, %v314_v52 }
  0xd7   :  { %v235_v29 = vmul.f32 %v234_v8, %v2113_v9  ;;  %v247_v30 = vmul.f32 %v246_v11, %v2151_v33  ;;  %v498_v0 = vmul.f32 %v2271_v1, %v2214_v13  ;;  %vm538_vm9 = vweird.f32 %v2200_v2 }
  0xd8   :  { %v239_v36 = vand.u32 2147483648, %v2113_v9  ;;  %vm248_vm10 = vcmp.eq.f32.partialorder %v2151_v33, inf  ;;  %v220_v15 = vmul.f32 0.5, %v219_v62  ;;  %v560_v45 = vsel %vm2244_vm15, %v2210_v61, %v555_v24  ;;  %vm2334_vm13 = vmor %vm537_vm5, %vm538_vm9 }
  0xd9   :  { %v536_v47 = vadd.f32 %v2200_v2, %v535_v55  ;;  %vm2309_vm11 = vcmp.eq.f32.partialorder %v541_v10, 8.507059e+37  ;;  %v249_v48 = vsel %vm248_vm10, %v2151_v33, %v247_v30  ;;  %v251_v37 = vand.u32 2147483648, %v2151_v33 }
  0xda   :  { %v2316_v28 = vmul.f32 %v319_v44, %v1873_v20  ;;  %v580_v16 = vmul.f32 %v2236_v19, %v579_v17  ;;  %v586_v40 = vand.u32 2147483647, %v2169_v41  ;;  %vm250_vm12 = vcmp.eq.f32.partialorder %v2151_v33, 0.0 }
  0xdb   :  { %v2321_v61 = vpop.eup %1653  ;;  %v237_v14 = vsel %vm236_vm7, %v2113_v9, %v235_v29  ;;  %v252_v3 = vsel %vm250_vm12, %v251_v37, %v249_v48  ;;  %v221_v42 = vsub.f32 1.5, %v220_v15  ;;  %v499_v51 = vmul.f32 %v2271_v1, %v498_v0 }
  0xdc   :  { %v1656_v18 = vpop.eup %1655  ;;  %v2328_v20 = vmul.f32 %v560_v45, %v1878_v22  ;;  %vm582_vm14 = vweird.f32 %v2169_v41  ;;  %v588_v35 = vand.u32 2147483648, %v2169_v41  ;;  %v2340_v57 = vmax.f32 %v252_v3, 1e-12 }
  0xdd   :  { %v540_v59 = vsel %vm2334_vm13, %v2200_v2, %v536_v47  ;;  %v563_v22 = vmul.f32 %v1656_v18, %v2278_v38  ;;  %v222_v63 = vmul.f32 %v2241_v50, %v221_v42  ;;  %vm224_vm15 = vcmp.eq.f32.partialorder %v2196_v58, inf }
  0xde   :  { %v581_v60 = vadd.f32 %v2236_v19, %v580_v16  ;;  %vm583_vm1 = vweird.f32 %v2236_v19  ;;  %vm2352_vm2 = vcmp.eq.f32.partialorder %v586_v40, 8.507059e+37  ;;  %v593_v10 = vmul.f32 %v2321_v61, %v2250_v53 }
  0xdf   :  { %v240_v2 = vsel %vm238_vm8, %v239_v36, %v237_v14  ;;  %v564_v7 = vsub.f32 1.0, %v563_v22  ;;  %1657 = vrcp.f32 %v2340_v57  ;;  %v223_v50 = vmul.f32 %v222_v63, %v2196_v58  ;;  %vm2368_vm4 = vmor %vm582_vm14, %vm583_vm1 }
  0xe0   :  { %v500_v8 = vmul.f32 0.5, %v499_v51  ;;  %v573_v12 = vand.u32 2147483648, %v2278_v38  ;;  %vm226_vm3 = vcmp.eq.f32.partialorder %v2196_v58, 0.0  ;;  %v227_v52 = vand.u32 2147483648, %v2196_v58 }
  0xe1   :  { %1659 = vrsqrt.f32 %v2348_v21  ;;  %v565_v9 = vmul.f32 %v1656_v18, %v564_v7  ;;  %vm568_vm5 = vweird.f32 %v1656_v18  ;;  %v571_v25 = vand.u32 2147483647, %v2278_v38 }
  0xe2   :  { %v2373_v55 = vmax.f32 %v240_v2, 1e-12  ;;  %v545_v11 = vsel %vm2309_vm11, %v2276_v54, %v540_v59  ;;  %v585_v24 = vsel %vm2368_vm4, %v2236_v19, %v581_v60  ;;  %v225_v41 = vsel %vm224_vm15, %v2196_v58, %v223_v50 }
  0xe3   :  { %v501_v17 = vsub.f32 1.5, %v500_v8  ;;  %v594_v44 = vsub.f32 1.0, %v593_v10  ;;  %v566_v29 = vadd.f32 %v1656_v18, %v565_v9  ;;  %vm567_vm6 = vweird.f32 %v2278_v38 }
  0xe4   :  { %v228_v30 = vsel %vm226_vm3, %v227_v52, %v225_v41  ;;  %vm569_vm7 = vmor %vm567_vm6, %vm568_vm5  ;;  %v574_v0 = vor.u32 1.1754944e-38, %v573_v12  ;;  %v637_v15 = vmul.f32 %v2223_v27, %v2110_v46  ;;  %v589_v45 = vor.u32 1.1754944e-38, %v588_v35 }
  0xe5   :  { %v2385_v36 = vmax.f32 %v228_v30, 1e-12  ;;  %v502_v54 = vmul.f32 %v2271_v1, %v501_v17  ;;  %v2390_v19 = vpop.eup %1657  ;;  %v570_v47 = vsel %vm569_vm7, %v1656_v18, %v566_v29  ;;  %vm572_vm8 = vcmp.eq.f32.partialorder %v571_v25, 8.507059e+37 }
  0xe6   :  { %1661 = vrcp.f32 %v2373_v55  ;;  %v2394_v38 = vmul.f32 %v545_v11, %v1880_v23  ;;  %v575_v39 = vsel %vm572_vm8, %v574_v0, %v570_v47  ;;  %vm504_vm9 = vcmp.eq.f32.partialorder %v2214_v13, inf }
  0xe7   :  { %v1660_v58 = vpop.eup %1659  ;;  %1663 = vrcp.f32 %v2385_v36  ;;  %v590_v1 = vsel %vm2352_vm2, %v589_v45, %v585_v24  ;;  %v595_v48 = vmul.f32 %v2321_v61, %v594_v44  ;;  %v601_v37 = vand.u32 2147483647, %v2250_v53 }
  0xe8   :  { %vm506_vm10 = vcmp.eq.f32.partialorder %v2214_v13, 0.0  ;;  %v367_v16 = vmul.f32 %v2390_v19, %v2340_v57  ;;  %v503_v23 = vmul.f32 %v502_v54, %v2214_v13  ;;  %v486_v40 = vmul.f32 %v1660_v58, %v2348_v21 }
  0xe9   :  { %v645_v14 = vsel %vm58_vm0, %v637_v15, 0.0  ;;  %v603_v3 = vand.u32 2147483648, %v2250_v53  ;;  %v2410_v42 = vmul.f32 %v575_v39, %v1897_v34  ;;  %v507_v51 = vand.u32 2147483648, %v2214_v13 }
  0xea   :  { %646 = vadd.xlane.f32.xlu1 %v645_v14  ;;  %v639_v18 = vmul.f32 %v2328_v20, %v2107_v6  ;;  %v2416_v33 = vmul.f32 %v590_v1, %v1892_v31  ;;  %v505_v35 = vsel %vm504_vm9, %v2214_v13, %v503_v23  ;;  %v487_v59 = vmul.f32 %v1660_v58, %v486_v40 }
  0xeb   :  { %v638_v22 = vmul.f32 %v2394_v38, %v2188_v56  ;;  %v596_v34 = vadd.f32 %v2321_v61, %v595_v48  ;;  %vm598_vm11 = vweird.f32 %v2321_v61  ;;  %v508_v60 = vsel %vm506_vm10, %v507_v51, %v505_v35 }
  0xec   :  { %v2421_v63 = vpop.eup %1661  ;;  %v651_v5 = vsel %vm58_vm0, %v639_v18, 0.0  ;;  %v368_v31 = vsub.f32 1.0, %v367_v16  ;;  %v2428_v2 = vmax.f32 %v508_v60, 1e-12  ;;  %v488_v7 = vmul.f32 0.5, %v487_v59 }
  0xed   :  { %v1664_v10 = vpop.eup %1663  ;;  %652 = vadd.xlane.f32.xlu0 %v651_v5  ;;  %v648_v50 = vsel %vm58_vm0, %v638_v22, 0.0  ;;  %v2433_v8 = vmul.f32 %v2174_v26, %v1849_v4  ;;  %vm597_vm12 = vweird.f32 %v2250_v53  ;;  %v640_v13 = vmul.f32 %v2410_v42, %v2316_v28 }
  0xee   :  { %v337_v12 = vmul.f32 %v1664_v10, %v2385_v36  ;;  %649 = vadd.xlane.f32.xlu2 %v648_v50  ;;  %vm2439_vm13 = vmor %vm597_vm12, %vm598_vm11  ;;  %vm2443_vm14 = vcmp.eq.f32.partialorder %v601_v37, 8.507059e+37  ;;  %v604_v9 = vor.u32 1.1754944e-38, %v603_v3  ;;  %v352_v4 = vmul.f32 %v2421_v63, %v2373_v55 }
  0xef   :  { %1665 = vrcp.f32 %v2428_v2  ;;  %v600_v26 = vsel %vm2439_vm13, %v2321_v61, %v596_v34  ;;  %vm371_vm15 = vweird.f32 %v2340_v57  ;;  %v489_v25 = vsub.f32 1.5, %v488_v7 }
  0xf0   :  { %v338_v53 = vsub.f32 1.0, %v337_v12  ;;  %v369_v11 = vmul.f32 %v2390_v19, %v368_v31  ;;  %v347_v24 = vand.u32 2147483648, %v2385_v36  ;;  %v641_v41 = vmul.f32 %v2416_v33, %v2433_v8 }
  0xf1   :  { %v654_v17 = vsel %vm58_vm0, %v640_v13, 0.0  ;;  %vm342_vm1 = vweird.f32 %v1664_v10  ;;  %v345_v29 = vand.u32 2147483647, %v2385_v36  ;;  %v490_v30 = vmul.f32 %v1660_v58, %v489_v25 }
  0xf2   :  { %v339_v44 = vmul.f32 %v1664_v10, %v338_v53  ;;  %655 = vadd.xlane.f32.xlu1 %v654_v17  ;;  %v605_v61 = vsel %vm2443_vm14, %v604_v9, %v600_v26  ;;  %v353_v0 = vsub.f32 1.0, %v352_v4  ;;  %vm492_vm2 = vcmp.eq.f32.partialorder %v2348_v21, inf  ;;  %v1703_v4 = vld [vmem:[#allocation5 + $0x38] sm:$0xff] }
  0xf3   :  { %vm494_vm3 = vcmp.eq.f32.partialorder %v2348_v21, 0.0  ;;  %vm341_vm4 = vweird.f32 %v2385_v36  ;;  %v491_v15 = vmul.f32 %v490_v30, %v2348_v21  ;;  %v495_v45 = vand.u32 2147483648, %v2348_v21 }
  0xf4   :  { %v340_v54 = vadd.f32 %v1664_v10, %v339_v44  ;;  %v370_v39 = vadd.f32 %v2390_v19, %v369_v11  ;;  %vm372_vm5 = vweird.f32 %v2390_v19  ;;  %vm343_vm6 = vmor %vm341_vm4, %vm342_vm1  ;;  %v348_v58 = vor.u32 1.1754944e-38, %v347_v24 }
  0xf5   :  { %v1666_v47 = vpop.eup %1665  ;;  %v657_v1 = vsel %vm58_vm0, %v641_v41, 0.0  ;;  %vm346_vm7 = vcmp.eq.f32.partialorder %v345_v29, 8.507059e+37  ;;  %v493_v36 = vsel %vm492_vm2, %v2348_v21, %v491_v15  ;;  %v375_v16 = vand.u32 2147483647, %v2340_v57  ;;  %vm2480_vm8 = vmor %vm371_vm15, %vm372_vm5 }
  0xf6   :  { %v344_v48 = vsel %vm343_vm6, %v1664_v10, %v340_v54  ;;  %v623_v37 = vmul.f32 %v1666_v47, %v2428_v2  ;;  %658 = vadd.xlane.f32.xlu2 %v657_v1  ;;  %v377_v23 = vand.u32 2147483648, %v2340_v57  ;;  %v496_v14 = vsel %vm494_vm3, %v495_v45, %v493_v36 }
  0xf7   :  { %v349_v40 = vsel %vm346_vm7, %v348_v58, %v344_v48  ;;  %v354_v3 = vmul.f32 %v2421_v63, %v353_v0  ;;  %v2487_v59 = vmax.f32 %v496_v14, 1e-12  ;;  %v2490_v22 = vmul.f32 %v605_v61, %v1894_v32  ;;  %v1704_v48 = vld [vmem:[#allocation5 + $0x30] sm:$0xff] }
  0xf8   :  { %v2485_v18 = vmul.f32 %v349_v40, %v1908_v43  ;;  %v624_v35 = vsub.f32 1.0, %v623_v37  ;;  %v374_v21 = vsel %vm2480_vm8, %v2390_v19, %v370_v39  ;;  %v633_v34 = vand.u32 2147483648, %v2428_v2 }
  0xf9   :  { %vm628_vm9 = vweird.f32 %v1666_v47  ;;  %v631_v60 = vand.u32 2147483647, %v2428_v2  ;;  %1667 = vrcp.f32 %v2487_v59  ;;  %vm357_vm10 = vweird.f32 %v2421_v63 }
  0xfa   :  { %v625_v57 = vmul.f32 %v1666_v47, %v624_v35  ;;  %vm376_vm11 = vcmp.eq.f32.partialorder %v375_v16, 8.507059e+37  ;;  %v378_v43 = vor.u32 1.1754944e-38, %v377_v23  ;;  %v642_v32 = vmul.f32 %v2490_v22, %v2485_v18 }
  0xfb   :  { %v355_v5 = vadd.f32 %v2421_v63, %v354_v3  ;;  %vm627_vm12 = vweird.f32 %v2428_v2  ;;  %v855_v19 = vperm.slane %v2223_v27, 0  ;;  %v362_v31 = vand.u32 2147483648, %v2373_v55 }
  0xfc   :  { %v626_v10 = vadd.f32 %v1666_v47, %v625_v57  ;;  %v379_v7 = vsel %vm376_vm11, %v378_v43, %v374_v21  ;;  %vm629_vm13 = vmor %vm627_vm12, %vm628_vm9  ;;  %v634_v50 = vor.u32 1.1754944e-38, %v633_v34  ;;  %v660_v12 = vsel %vm58_vm0, %v642_v32, 0.0  ;;  %v1705_v43 = vld [vmem:[#allocation2 + $0x30] sm:$0xff] }
  0xfd   :  { %vm356_vm14 = vweird.f32 %v2373_v55  ;;  %v360_v13 = vand.u32 2147483647, %v2373_v55  ;;  %vm632_vm15 = vcmp.eq.f32.partialorder %v631_v60, 8.507059e+37  ;;  %661 = vadd.xlane.f32.xlu0 %v660_v12  ;;  %v2511_v26 = vmul.f32 %v1703_v4, %v379_v7 }
  0xfe   :  { %v630_v52 = vsel %vm629_vm13, %v1666_v47, %v626_v10  ;;  %vm358_vm1 = vmor %vm356_vm14, %vm357_vm10  ;;  %v863_v25 = vmul.f32 %v855_v19, %v2110_v46  ;;  %v363_v11 = vor.u32 1.1754944e-38, %v362_v31  ;;  %v960_v41 = vperm.slane %v2223_v27, 1 }
  0xff   :  { %v635_v2 = vsel %vm632_vm15, %v634_v50, %v630_v52  ;;  %v1668_v62 = vpop.eup %1667  ;;  %v359_v9 = vsel %vm358_vm1, %v2421_v63, %v355_v5  ;;  %vm361_vm2 = vcmp.eq.f32.partialorder %v360_v13, 8.507059e+37  ;;  %v961_v63 = vperm.slane %v2394_v38, 1 }
 0x100   :  { %v2514_v53 = vmul.f32 %v635_v2, %v1914_v49  ;;  %v608_v55 = vmul.f32 %v1668_v62, %v2487_v59  ;;  %v364_v17 = vsel %vm361_vm2, %v363_v11, %v359_v9  ;;  %v962_v29 = vperm.slane %v2328_v20, 1 }
 0x101   :  { %v618_v49 = vand.u32 2147483648, %v2487_v59  ;;  %v871_v61 = vsel %vm58_vm0, %v863_v25, 0.0  ;;  %v1109_v0 = vperm.slane %v2394_v38, 3  ;;  %vm613_vm3 = vweird.f32 %v1668_v62 }
 0x102   :  { %v644_v24 = vmul.f32 %v2514_v53, %v2511_v26  ;;  %v609_v44 = vsub.f32 1.0, %v608_v55  ;;  %v616_v15 = vand.u32 2147483647, %v2487_v59  ;;  %v1108_v45 = vperm.slane %v2223_v27, 3 }
 0x103   :  { %v968_v47 = vmul.f32 %v960_v41, %v2110_v46  ;;  %v2531_v39 = vmul.f32 %v1109_v0, %v2188_v56  ;;  %v1038_v58 = vperm.slane %v2416_v33, 2  ;;  %v1110_v1 = vperm.slane %v2328_v20, 3 }
 0x104   :  { %v666_v30 = vsel %vm58_vm0, %v644_v24, 0.0  ;;  %v610_v54 = vmul.f32 %v1668_v62, %v609_v44  ;;  %v2535_v37 = vmul.f32 %v1704_v48, %v364_v17  ;;  %vm612_vm4 = vweird.f32 %v2487_v59 }
 0x105   :  { %667 = vadd.xlane.f32.xlu2 %v666_v30  ;;  %872 = vadd.xlane.f32.xlu0 %v871_v61  ;;  %v2539_v16 = vmul.f32 %v1108_v45, %v2110_v46  ;;  %vm614_vm5 = vmor %vm612_vm4, %vm613_vm3  ;;  %v619_v23 = vor.u32 1.1754944e-38, %v618_v49  ;;  %v969_v40 = vmul.f32 %v961_v63, %v2188_v56  ;;  %v2543_v14 = vmul.f32 %v1038_v58, %v2433_v8 }
 0x106   :  { %v611_v36 = vadd.f32 %v1668_v62, %v610_v54  ;;  %v2546_v3 = vmul.f32 %v1110_v1, %v2107_v6  ;;  %vm617_vm6 = vcmp.eq.f32.partialorder %v616_v15, 8.507059e+37  ;;  %v1039_v35 = vperm.slane %v2490_v22, 2 }
 0x107   :  { %v862_v21 = vperm.slane %v2514_v53, 0  ;;  %v976_v34 = vsel %vm58_vm0, %v968_v47, 0.0  ;;  %v856_v57 = vperm.slane %v2394_v38, 0  ;;  %v970_v60 = vmul.f32 %v962_v29, %v2107_v6 }
 0x108   :  { %v615_v51 = vsel %vm614_vm5, %v1668_v62, %v611_v36  ;;  %v2556_v5 = vmul.f32 %v1039_v35, %v2485_v18  ;;  %v1182_v19 = vperm.slane %v2223_v27, 4  ;;  %v1183_v31 = vperm.slane %v2394_v38, 4 }
 0x109   :  { %v620_v59 = vsel %vm617_vm6, %v619_v23, %v615_v51  ;;  %v2559_v10 = vmul.f32 %v862_v21, %v2511_v26  ;;  %v1111_v7 = vperm.slane %v2410_v42, 3  ;;  %v1112_v50 = vperm.slane %v2416_v33, 3 }
 0x10a   :  { %v2553_v32 = vmul.f32 %v1705_v43, %v620_v59  ;;  %v1184_v12 = vperm.slane %v2328_v20, 4  ;;  %v979_v52 = vsel %vm58_vm0, %v969_v40, 0.0  ;;  %v858_v2 = vperm.slane %v2410_v42, 0 }
 0x10b   :  { %v2571_v62 = vmul.f32 %v1182_v19, %v2110_v46  ;;  %v2574_v9 = vmul.f32 %v1183_v31, %v2188_v56  ;;  %v2577_v4 = vmul.f32 %v1111_v7, %v2316_v28  ;;  %v2581_v11 = vmul.f32 %v1112_v50, %v2433_v8 }
 0x10c   :  { %v643_v13 = vmul.f32 %v2553_v32, %v2535_v37  ;;  %v864_v55 = vmul.f32 %v856_v57, %v2188_v56  ;;  %v982_v24 = vsel %vm58_vm0, %v970_v60, 0.0  ;;  %v2586_v41 = vmul.f32 %v1184_v12, %v2107_v6 }
 0x10d   :  { %977 = vadd.xlane.f32.xlu2 %v976_v34  ;;  %980 = vadd.xlane.f32.xlu0 %v979_v52  ;;  %v866_v17 = vmul.f32 %v858_v2, %v2316_v28  ;;  %v857_v44 = vperm.slane %v2328_v20, 0  ;;  %v1034_v63 = vperm.slane %v2223_v27, 2  ;;  %v1040_v29 = vperm.slane %v2553_v32, 2 }
 0x10e   :  { %v663_v25 = vsel %vm58_vm0, %v643_v13, 0.0  ;;  %v1035_v49 = vperm.slane %v2394_v38, 2  ;;  %v1113_v30 = vperm.slane %v2490_v22, 3  ;;  %v1185_v61 = vperm.slane %v2410_v42, 4 }
 0x10f   :  { %664 = vadd.xlane.f32.xlu1 %v663_v25  ;;  %v1041_v0 = vperm.slane %v2514_v53, 2  ;;  %v2597_v54 = vmul.f32 %v1040_v29, %v2535_v37  ;;  %v1257_v15 = vperm.slane %v2394_v38, 5  ;;  %v1114_v45 = vperm.slane %v2553_v32, 3 }
 0x110   :  { %v1256_v47 = vperm.slane %v2223_v27, 5  ;;  %v2603_v58 = vmul.f32 %v1113_v30, %v2485_v18  ;;  %v2606_v1 = vmul.f32 %v1185_v61, %v2316_v28  ;;  %v1258_v36 = vperm.slane %v2328_v20, 5 }
 0x111   :  { %v2609_v48 = vmul.f32 %v1041_v0, %v2511_v26  ;;  %v880_v23 = vsel %vm58_vm0, %v866_v17, 0.0  ;;  %v2614_v40 = vmul.f32 %v1257_v15, %v2188_v56  ;;  %v2617_v51 = vmul.f32 %v1114_v45, %v2535_v37 }
 0x112   :  { %v2620_v35 = vmul.f32 %v1256_v47, %v2110_v46  ;;  %v874_v21 = vsel %vm58_vm0, %v864_v55, 0.0  ;;  %v865_v59 = vmul.f32 %v857_v44, %v2107_v6  ;;  %v2625_v34 = vmul.f32 %v1258_v36, %v2107_v6 }
 0x113   :  { %v1042_v57 = vmul.f32 %v1034_v63, %v2110_v46  ;;  %v1043_v60 = vmul.f32 %v1035_v49, %v2188_v56  ;;  %v964_v43 = vperm.slane %v2416_v33, 1  ;;  %v1115_v19 = vperm.slane %v2514_v53, 3 }
 0x114   :  { %v1036_v31 = vperm.slane %v2328_v20, 2  ;;  %v1186_v7 = vperm.slane %v2416_v33, 4  ;;  %v1259_v50 = vperm.slane %v2410_v42, 5  ;;  %v1330_v12 = vperm.slane %v2223_v27, 6 }
 0x115   :  { %983 = vadd.xlane.f32.xlu2 %v982_v24  ;;  %881 = vadd.xlane.f32.xlu0 %v880_v23  ;;  %v2636_v13 = vmul.f32 %v1115_v19, %v2511_v26  ;;  %v1187_v52 = vperm.slane %v2490_v22, 4  ;;  %v1188_v2 = vperm.slane %v2553_v32, 4  ;;  %v1260_v25 = vperm.slane %v2416_v33, 5 }
 0x116   :  { %v2642_v55 = vmul.f32 %v1186_v7, %v2433_v8  ;;  %v2645_v24 = vmul.f32 %v1259_v50, %v2316_v28  ;;  %v2648_v17 = vmul.f32 %v1330_v12, %v2110_v46  ;;  %v1331_v44 = vperm.slane %v2394_v38, 6 }
 0x117   :  { %875 = vadd.xlane.f32.xlu1 %v874_v21  ;;  %v2652_v63 = vmul.f32 %v1187_v52, %v2485_v18  ;;  %v2655_v29 = vmul.f32 %v1188_v2, %v2535_v37  ;;  %v2658_v49 = vmul.f32 %v1260_v25, %v2433_v8  ;;  %v877_v30 = vsel %vm58_vm0, %v865_v59, 0.0 }
 0x118   :  { %v1050_v61 = vsel %vm58_vm0, %v1042_v57, 0.0  ;;  %v2663_v0 = vmul.f32 %v1331_v44, %v2188_v56  ;;  %v1053_v15 = vsel %vm58_vm0, %v1043_v60, 0.0  ;;  %v963_v45 = vperm.slane %v2410_v42, 1 }
 0x119   :  { %v972_v47 = vmul.f32 %v964_v43, %v2433_v8  ;;  %v1189_v36 = vperm.slane %v2514_v53, 4  ;;  %v1044_v23 = vmul.f32 %v1036_v31, %v2107_v6  ;;  %v1261_v21 = vperm.slane %v2490_v22, 5 }
 0x11a   :  { %v1332_v59 = vperm.slane %v2328_v20, 6  ;;  %v1404_v57 = vperm.slane %v2223_v27, 7  ;;  %v1405_v60 = vperm.slane %v2394_v38, 7  ;;  %v1333_v7 = vperm.slane %v2410_v42, 6 }
 0x11b   :  { %v2674_v19 = vmul.f32 %v1189_v36, %v2511_v26  ;;  %v1334_v43 = vperm.slane %v2416_v33, 6  ;;  %v2680_v50 = vmul.f32 %v1261_v21, %v2485_v18  ;;  %v1406_v27 = vperm.slane %v2328_v20, 7 }
 0x11c   :  { %v2683_v31 = vmul.f32 %v1332_v59, %v2107_v6  ;;  %v2686_v12 = vmul.f32 %v1404_v57, %v2110_v46  ;;  %v2690_v52 = vmul.f32 %v1405_v60, %v2188_v56  ;;  %v2693_v38 = vmul.f32 %v1333_v7, %v2316_v28 }
 0x11d   :  { %1051 = vadd.xlane.f32.xlu2 %v1050_v61  ;;  %1054 = vadd.xlane.f32.xlu0 %v1053_v15  ;;  %v2696_v2 = vmul.f32 %v1334_v43, %v2433_v8  ;;  %v971_v25 = vmul.f32 %v963_v45, %v2316_v28  ;;  %v859_v44 = vperm.slane %v2416_v33, 0  ;;  %v988_v46 = vsel %vm58_vm0, %v972_v47, 0.0 }
 0x11e   :  { %v1056_v20 = vsel %vm58_vm0, %v1044_v23, 0.0  ;;  %v965_v56 = vperm.slane %v2490_v22, 1  ;;  %v1262_v61 = vperm.slane %v2553_v32, 5  ;;  %v1037_v15 = vperm.slane %v2410_v42, 2 }
 0x11f   :  { %878 = vadd.xlane.f32.xlu1 %v877_v30  ;;  %v2701_v30 = vmul.f32 %v1406_v27, %v2107_v6  ;;  %v1335_v36 = vperm.slane %v2490_v22, 6  ;;  %v1407_v21 = vperm.slane %v2410_v42, 7  ;;  %v1263_v45 = vperm.slane %v2514_v53, 5 }
 0x120   :  { %v2712_v6 = vmul.f32 %v1262_v61, %v2535_v37  ;;  %v1408_v47 = vperm.slane %v2416_v33, 7  ;;  %v1337_v23 = vperm.slane %v2514_v53, 6  ;;  %v1336_v59 = vperm.slane %v2553_v32, 6 }
 0x121   :  { %v2718_v57 = vmul.f32 %v1335_v36, %v2485_v18  ;;  %v2721_v60 = vmul.f32 %v1407_v21, %v2316_v28  ;;  %v2724_v42 = vmul.f32 %v1263_v45, %v2511_v26  ;;  %v1410_v7 = vperm.slane %v2553_v32, 7 }
 0x122   :  { %v985_v43 = vsel %vm58_vm0, %v971_v25, 0.0  ;;  %v2729_v33 = vmul.f32 %v1408_v47, %v2433_v8  ;;  %v2732_v27 = vmul.f32 %v1337_v23, %v2511_v26  ;;  %v1045_v36 = vmul.f32 %v1037_v15, %v2316_v28 }
 0x123   :  { %v2739_v61 = vmul.f32 %v1410_v7, %v2535_v37  ;;  %v1411_v21 = vperm.slane %v2514_v53, 7  ;;  %v1409_v25 = vperm.slane %v2490_v22, 7  ;;  %v867_v45 = vmul.f32 %v859_v44, %v2433_v8 }
 0x124   :  { %v861_v7 = vperm.slane %v2553_v32, 0  ;;  %v860_v15 = vperm.slane %v2490_v22, 0  ;;  %v1130_v22 = vsel %vm58_vm0, %v2546_v3, 0.0  ;;  %v1201_v3 = vsel %vm58_vm0, %v2574_v9, 0.0 }
 0x125   :  { %989 = vadd.xlane.f32.xlu2 %v988_v46  ;;  %1057 = vadd.xlane.f32.xlu0 %v1056_v20  ;;  %v2735_v46 = vmul.f32 %v1336_v59, %v2535_v37  ;;  %v973_v20 = vmul.f32 %v965_v56, %v2485_v18  ;;  %v2746_v47 = vmul.f32 %v1411_v21, %v2511_v26  ;;  %v1059_v56 = vsel %vm58_vm0, %v1045_v36, 0.0 }
 0x126   :  { %v2750_v59 = vmul.f32 %v1409_v25, %v2485_v18  ;;  %v883_v28 = vsel %vm58_vm0, %v867_v45, 0.0  ;;  %v869_v8 = vmul.f32 %v861_v7, %v2535_v37  ;;  %v868_v44 = vmul.f32 %v860_v15, %v2485_v18 }
 0x127   :  { %986 = vadd.xlane.f32.xlu1 %v985_v43  ;;  %v991_v23 = vsel %vm58_vm0, %v973_v20, 0.0  ;;  %v1127_v43 = vsel %vm58_vm0, %v2531_v39, 0.0  ;;  %v1062_v21 = vsel %vm58_vm0, %v2543_v14, 0.0  ;;  %v967_v25 = vperm.slane %v2514_v53, 1 }
 0x128   :  { %v889_v20 = vsel %vm58_vm0, %v869_v8, 0.0  ;;  %v886_v36 = vsel %vm58_vm0, %v868_v44, 0.0  ;;  %v1124_v18 = vsel %vm58_vm0, %v2539_v16, 0.0  ;;  %v966_v39 = vperm.slane %v2553_v32, 1 }
 0x129   :  { %v975_v45 = vmul.f32 %v967_v25, %v2511_v26  ;;  %v1065_v53 = vsel %vm58_vm0, %v2556_v5, 0.0  ;;  %v1198_v16 = vsel %vm58_vm0, %v2571_v62, 0.0  ;;  %v892_v26 = vsel %vm58_vm0, %v2559_v10, 0.0 }
 0x12a   :  { %v1204_v32 = vsel %vm58_vm0, %v2586_v41, 0.0  ;;  %v1133_v5 = vsel %vm58_vm0, %v2577_v4, 0.0  ;;  %v1139_v62 = vsel %vm58_vm0, %v2603_v58, 0.0  ;;  %v1207_v10 = vsel %vm58_vm0, %v2606_v1, 0.0 }
 0x12b   :  { %v1068_v41 = vsel %vm58_vm0, %v2597_v54, 0.0  ;;  %v1275_v1 = vsel %vm58_vm0, %v2614_v40, 0.0  ;;  %v1142_v44 = vsel %vm58_vm0, %v2617_v51, 0.0  ;;  %v1071_v54 = vsel %vm58_vm0, %v2609_v48, 0.0 }
 0x12c   :  { %v1145_v48 = vsel %vm58_vm0, %v2636_v13, 0.0  ;;  %vm920_vm15 = vcmask 1041409   ;;  %vm922_vm2 = vcmask 1042434  }
 0x12d   :  { %992 = vadd.xlane.f32.xlu2 %v991_v23  ;;  %1060 = vadd.xlane.f32.xlu0 %v1059_v56  ;;  %v974_v23 = vmul.f32 %v966_v39, %v2535_v37  ;;  %v997_v56 = vsel %vm58_vm0, %v975_v45, 0.0  ;;  %v1136_v37 = vsel %vm58_vm0, %v2581_v11, 0.0 }
 0x12f   :  { %884 = vadd.xlane.f32.xlu1 %v883_v28  ;;  %v994_v14 = vsel %vm58_vm0, %v974_v23, 0.0  ;;  %v1272_v23 = vsel %vm58_vm0, %v2620_v35, 0.0  ;;  %v1281_v35 = vsel %vm58_vm0, %v2645_v24, 0.0 }
 0x135   :  { %1128 = vadd.xlane.f32.xlu2 %v1127_v43  ;;  %890 = vadd.xlane.f32.xlu0 %v889_v20 }
 0x137   :  { %887 = vadd.xlane.f32.xlu1 %v886_v36 }
 0x13d   :  { %1063 = vadd.xlane.f32.xlu2 %v1062_v21  ;;  %1131 = vadd.xlane.f32.xlu0 %v1130_v22  ;;  %v1278_v22 = vsel %vm58_vm0, %v2625_v34, 0.0 }
 0x13f   :  { %1125 = vadd.xlane.f32.xlu1 %v1124_v18 }
 0x145   :  { %998 = vadd.xlane.f32.xlu2 %v997_v56  ;;  %1066 = vadd.xlane.f32.xlu0 %v1065_v53 }
 0x147   :  { %995 = vadd.xlane.f32.xlu1 %v994_v14 }
 0x14d   :  { %1199 = vadd.xlane.f32.xlu2 %v1198_v16  ;;  %1202 = vadd.xlane.f32.xlu0 %v1201_v3 }
 0x14f   :  { %893 = vadd.xlane.f32.xlu1 %v892_v26  ;;  %v1210_v26 = vsel %vm58_vm0, %v2642_v55, 0.0  ;;  %v1284_v55 = vsel %vm58_vm0, %v2658_v49, 0.0  ;;  %v2863_v49 = vsel %vm58_vm0, %v2680_v50, 0.0  ;;  %v2872_v50 = vsel %vm58_vm0, %v2683_v31, 0.0 }
 0x150   :  { %v2890_v31 = vsel %vm58_vm0, %v2696_v2, 0.0  ;;  %v2903_v2 = vsel %vm58_vm0, %v2701_v30, 0.0 }
 0x155   :  { %1137 = vadd.xlane.f32.xlu2 %v1136_v37  ;;  %1205 = vadd.xlane.f32.xlu0 %v1204_v32  ;;  %v1346_v32 = vsel %vm58_vm0, %v2648_v17, 0.0  ;;  %v2851_v17 = vsel %vm58_vm0, %v2663_v0, 0.0 }
 0x157   :  { %1134 = vadd.xlane.f32.xlu1 %v1133_v5  ;;  %v1213_v5 = vsel %vm58_vm0, %v2652_v63, 0.0  ;;  %v2855_v63 = vsel %vm58_vm0, %v2674_v19, 0.0 }
 0x15d   :  { %v2790_v9 = vpop.xlane.xlu1 %646  ;;  %1140 = vadd.xlane.f32.xlu2 %v1139_v62  ;;  %1208 = vadd.xlane.f32.xlu0 %v1207_v10 }
 0x15e   :  { %v669_v11 = vmul.f32 %v2790_v9, %v2790_v9  ;;  %vm821_vm11 = vcmp.gt.f32.partialorder %v2790_v9, -0.87758255 }
 0x15f   :  { %1069 = vadd.xlane.f32.xlu1 %v1068_v41  ;;  %v1216_v41 = vsel %vm58_vm0, %v2655_v29, 0.0 }
 0x160   :  { %v677_v7 = vsub.f32 1.0, %v669_v11  ;;  %v2798_v28 = vpop.xlane.xlu0 %652 }
 0x161   :  { %v671_v58 = vmul.f32 %v2798_v28, %v2798_v28  ;;  %v2811_v20 = vpop.xlane.xlu2 %649  ;;  %vm823_vm14 = vcmp.gt.f32.partialorder %v2798_v28, -0.87758255 }
 0x162   :  { %v685_v4 = vmax.f32 %v677_v7, 0.0  ;;  %v670_v36 = vmul.f32 %v2811_v20, %v2811_v20  ;;  %vm822_vm1 = vcmp.gt.f32.partialorder %v2811_v20, -0.87758255 }
 0x163   :  { %v679_v8 = vsub.f32 1.0, %v671_v58 }
 0x164   :  { %v2802_v15 = vmin.f32 %v685_v4, 1.0  ;;  %v678_v40 = vsub.f32 1.0, %v670_v36 }
 0x165   :  { %1276 = vadd.xlane.f32.xlu2 %v1275_v1  ;;  %1143 = vadd.xlane.f32.xlu0 %v1142_v44  ;;  %v687_v43 = vmax.f32 %v679_v8, 0.0  ;;  %v2841_v11 = vpop.xlane.xlu1 %655 }
 0x166   :  { %1669 = vrsqrt.f32 %v2802_v15  ;;  %v686_v51 = vmax.f32 %v678_v40, 0.0  ;;  %v672_v24 = vmul.f32 %v2841_v11, %v2841_v11  ;;  %vm708_vm7 = vcmp.eq.f32.partialorder %v2802_v15, inf }
 0x167   :  { %1072 = vadd.xlane.f32.xlu1 %v1071_v54  ;;  %v2815_v21 = vmin.f32 %v687_v43, 1.0  ;;  %v711_v8 = vand.u32 2147483648, %v2802_v15  ;;  %vm710_vm8 = vcmp.eq.f32.partialorder %v2802_v15, 0.0  ;;  %v2876_v40 = vsel %vm58_vm0, %v2686_v12, 0.0 }
 0x168   :  { %v2823_v39 = vmin.f32 %v686_v51, 1.0  ;;  %v680_v44 = vsub.f32 1.0, %v672_v24 }
 0x169   :  { %1671 = vrsqrt.f32 %v2815_v21  ;;  %v2827_v56 = vpop.xlane.xlu2 %658  ;;  %vm732_vm9 = vcmp.eq.f32.partialorder %v2815_v21, inf  ;;  %vm734_vm10 = vcmp.eq.f32.partialorder %v2815_v21, 0.0 }
 0x16a   :  { %1673 = vrsqrt.f32 %v2823_v39  ;;  %v673_v14 = vmul.f32 %v2827_v56, %v2827_v56  ;;  %v688_v51 = vmax.f32 %v680_v44, 0.0  ;;  %vm720_vm12 = vcmp.eq.f32.partialorder %v2823_v39, inf }
 0x16b   :  { %vm722_vm13 = vcmp.eq.f32.partialorder %v2823_v39, 0.0  ;;  %v798_v44 = vmul.f32 0.87758255, %v2811_v20  ;;  %vm825_vm5 = vcmp.gt.f32.partialorder %v2827_v56, -0.87758255 }
 0x16c   :  { %v1670_v25 = vpop.eup %1669  ;;  %v681_v3 = vsub.f32 1.0, %v673_v14 }
 0x16d   :  { %v702_v18 = vmul.f32 %v1670_v25, %v2802_v15  ;;  %1279 = vadd.xlane.f32.xlu2 %v1278_v22  ;;  %1146 = vadd.xlane.f32.xlu0 %v1145_v48  ;;  %v2880_v22 = vsel %vm58_vm0, %v2690_v52, 0.0 }
 0x16e   :  { %v689_v10 = vmax.f32 %v681_v3, 0.0 }
 0x16f   :  { %v703_v45 = vmul.f32 %v1670_v25, %v702_v18  ;;  %1273 = vadd.xlane.f32.xlu1 %v1272_v23  ;;  %v1672_v53 = vpop.eup %1671  ;;  %v853_v18 = vlaneseq }
 0x170   :  { %v726_v16 = vmul.f32 %v1672_v53, %v2815_v21  ;;  %v1674_v7 = vpop.eup %1673  ;;  %v2859_v1 = vmin.f32 %v689_v10, 1.0  ;;  %v2895_v52 = vpop.xlane.xlu0 %661 }
 0x171   :  { %v704_v34 = vmul.f32 0.5, %v703_v45  ;;  %v714_v29 = vmul.f32 %v1674_v7, %v2823_v39  ;;  %v735_v45 = vand.u32 2147483648, %v2815_v21 }
 0x172   :  { %v727_v37 = vmul.f32 %v1672_v53, %v726_v16  ;;  %1675 = vrsqrt.f32 %v2859_v1  ;;  %v797_v16 = vmul.f32 0.87758255, %v2790_v9  ;;  %vm756_vm3 = vcmp.eq.f32.partialorder %v2859_v1, inf }
 0x173   :  { %v705_v13 = vsub.f32 1.5, %v704_v34  ;;  %v715_v54 = vmul.f32 %v1674_v7, %v714_v29  ;;  %v674_v34 = vmul.f32 %v2895_v52, %v2895_v52  ;;  %vm758_vm4 = vcmp.eq.f32.partialorder %v2859_v1, 0.0 }
 0x174   :  { %v728_v4 = vmul.f32 0.5, %v727_v37 }
 0x175   :  { %v706_v62 = vmul.f32 %v1670_v25, %v705_v13  ;;  %1282 = vadd.xlane.f32.xlu2 %v1281_v35  ;;  %1347 = vadd.xlane.f32.xlu0 %v1346_v32  ;;  %v716_v25 = vmul.f32 0.5, %v715_v54 }
 0x176   :  { %v729_v0 = vsub.f32 1.5, %v728_v4 }
 0x177   :  { %v707_v58 = vmul.f32 %v706_v62, %v2802_v15  ;;  %1211 = vadd.xlane.f32.xlu1 %v1210_v26  ;;  %v717_v23 = vsub.f32 1.5, %v716_v25  ;;  %v2908_v26 = vand.u32 127, %v853_v18  ;;  %v682_v62 = vsub.f32 1.0, %v674_v34 }
 0x178   :  { %v730_v36 = vmul.f32 %v1672_v53, %v729_v0  ;;  %v2893_v53 = vmin.f32 %v688_v51, 1.0  ;;  %v1676_v14 = vpop.eup %1675  ;;  %v1590_v51 = vadd.f32 -0.23971277, %v2811_v20  ;;  %v759_v20 = vand.u32 2147483648, %v2859_v1 }
 0x179   :  { %v709_v19 = vsel %vm708_vm7, %v2802_v15, %v707_v58  ;;  %v2884_v15 = vsel %vm58_vm0, %v2693_v38, 0.0  ;;  %v718_v3 = vmul.f32 %v1674_v7, %v717_v23  ;;  %v750_v35 = vmul.f32 %v1676_v14, %v2859_v1 }
 0x17a   :  { %v712_v43 = vsel %vm710_vm8, %v711_v8, %v709_v19  ;;  %v731_v48 = vmul.f32 %v730_v36, %v2815_v21  ;;  %1677 = vrsqrt.f32 %v2893_v53  ;;  %v1589_v7 = vadd.f32 -0.23971277, %v2790_v9 }
 0x17b   :  { %v805_v12 = vmul.f32 0.47942555, %v712_v43  ;;  %v719_v30 = vmul.f32 %v718_v3, %v2823_v39  ;;  %v690_v24 = vmax.f32 %v682_v62, 0.0  ;;  %v2926_v43 = vpop.xlane.xlu2 %667  ;;  %vm744_vm6 = vcmp.eq.f32.partialorder %v2893_v53, inf }
 0x17c   :  { %v733_v38 = vsel %vm732_vm9, %v2815_v21, %v731_v48  ;;  %v799_v21 = vmul.f32 0.87758255, %v2798_v28  ;;  %vm924_vm7 = vcmask 1043459   ;;  %vm746_vm8 = vcmp.eq.f32.partialorder %v2893_v53, 0.0 }
 0x17d   :  { %1217 = vadd.xlane.f32.xlu2 %v1216_v41  ;;  %1285 = vadd.xlane.f32.xlu0 %v1284_v55  ;;  %v736_v13 = vsel %vm734_vm10, %v735_v45, %v733_v38  ;;  %v813_v32 = vsub.f32 %v797_v16, %v805_v12  ;;  %v723_v41 = vand.u32 2147483648, %v2823_v39  ;;  %v751_v55 = vmul.f32 %v1676_v14, %v750_v35 }
 0x17e   :  { %v807_v37 = vmul.f32 0.47942555, %v736_v13  ;;  %v721_v4 = vsel %vm720_vm12, %v2823_v39, %v719_v30  ;;  %v2924_v54 = vmin.f32 %v690_v24, 1.0  ;;  %v801_v38 = vmul.f32 0.87758255, %v2827_v56 }
 0x17f   :  { %1214 = vadd.xlane.f32.xlu1 %v1213_v5  ;;  %v1591_v5 = vadd.f32 -0.23971277, %v2798_v28  ;;  %v724_v58 = vsel %vm722_vm13, %v723_v41, %v721_v4  ;;  %v752_v29 = vmul.f32 0.5, %v751_v55  ;;  %v837_v0 = vsel %vm821_vm11, %v813_v32, %v1589_v7  ;;  %v873_v32 = vpop.xlane.xlu0 %872 }
 0x180   :  { %v815_v10 = vsub.f32 %v799_v21, %v807_v37  ;;  %v1678_v8 = vpop.eup %1677  ;;  %v806_v19 = vmul.f32 0.47942555, %v724_v58  ;;  %v676_v28 = vmul.f32 %v2926_v43, %v2926_v43  ;;  %1679 = vrsqrt.f32 %v2924_v54 }
 0x181   :  { %v753_v36 = vsub.f32 1.5, %v752_v29  ;;  %v738_v25 = vmul.f32 %v1678_v8, %v2893_v53  ;;  %v845_v48 = vmul.f32 20.0, %v837_v0  ;;  %v2962_v58 = vsel %vm58_vm0, %v2712_v6, 0.0 }
 0x182   :  { %v839_v39 = vsel %vm823_vm14, %v815_v10, %v1591_v5  ;;  %v814_v9 = vsub.f32 %v798_v44, %v806_v19  ;;  %v684_v34 = vsub.f32 1.0, %v676_v28  ;;  %v2942_v3 = vpop.xlane.xlu1 %664  ;;  %vm824_vm9 = vcmp.gt.f32.partialorder %v2841_v11, -0.87758255 }
 0x183   :  { %v754_v12 = vmul.f32 %v1676_v14, %v753_v36  ;;  %v847_v45 = vmul.f32 20.0, %v839_v39  ;;  %v675_v55 = vmul.f32 %v2942_v3, %v2942_v3  ;;  %vm926_vm10 = vcmask 1044484  }
 0x184   :  { %v838_v23 = vsel %vm822_vm1, %v814_v9, %v1590_v51  ;;  %v692_v14 = vmax.f32 %v684_v34, 0.0  ;;  %v978_v51 = vpop.xlane.xlu2 %977  ;;  %vm768_vm11 = vcmp.eq.f32.partialorder %v2924_v54, inf  ;;  %vm770_vm12 = vcmp.eq.f32.partialorder %v2924_v54, 0.0 }
 0x185   :  { %1220 = vadd.xlane.f32.xlu2 %v2855_v63  ;;  %1288 = vadd.xlane.f32.xlu0 %v2863_v49  ;;  %v739_v63 = vmul.f32 %v1678_v8, %v738_v25  ;;  %v846_v16 = vmul.f32 20.0, %v838_v23  ;;  %v755_v49 = vmul.f32 %v754_v12, %v2859_v1  ;;  %v914_v62 = vperm.slane %v847_v45, %v2908_v26 }
 0x186   :  { %v1680_v30 = vpop.eup %1679  ;;  %v2948_v41 = vmin.f32 %v692_v14, 1.0  ;;  %v683_v6 = vsub.f32 1.0, %v675_v55  ;;  %v800_v25 = vmul.f32 0.87758255, %v2841_v11  ;;  %v896_v45 = vmul.f32 20.0, %v873_v32 }
 0x187   :  { %1350 = vadd.xlane.f32.xlu1 %v2851_v17  ;;  %v740_v13 = vmul.f32 0.5, %v739_v63  ;;  %v912_v17 = vperm.slane %v845_v48, %v2908_v26  ;;  %v913_v21 = vperm.slane %v846_v16, %v2908_v26  ;;  %v757_v37 = vsel %vm756_vm3, %v2859_v1, %v755_v49  ;;  %v981_v49 = vpop.xlane.xlu0 %980 }
 0x188   :  { %v760_v10 = vsel %vm758_vm4, %v759_v20, %v757_v37  ;;  %v762_v5 = vmul.f32 %v1680_v30, %v2924_v54  ;;  %1681 = vrsqrt.f32 %v2948_v41  ;;  %v802_v63 = vmul.f32 0.87758255, %v2895_v52 }
 0x189   :  { %v741_v35 = vsub.f32 1.5, %v740_v13  ;;  %v921_v7 = vsel %vm920_vm15, %v913_v21, %v912_v17  ;;  %v809_v4 = vmul.f32 0.47942555, %v760_v10  ;;  %v1001_v16 = vmul.f32 20.0, %v978_v51 }
 0x18a   :  { %v2957_v1 = vsel %vm922_vm2, %v914_v62, %v921_v7  ;;  %v763_v44 = vmul.f32 %v1680_v30, %v762_v5  ;;  %v876_v13 = vpop.xlane.xlu1 %875  ;;  %vm826_vm13 = vcmp.gt.f32.partialorder %v2895_v52, -0.87758255  ;;  %v771_v14 = vand.u32 2147483648, %v2924_v54 }
 0x18b   :  { %v742_v24 = vmul.f32 %v1678_v8, %v741_v35  ;;  %v817_v29 = vsub.f32 %v801_v38, %v809_v4  ;;  %v1593_v8 = vadd.f32 -0.23971277, %v2827_v56  ;;  %v1592_v56 = vadd.f32 -0.23971277, %v2841_v11 }
 0x18c   :  { %v764_v39 = vmul.f32 0.5, %v763_v44  ;;  %v1002_v37 = vmul.f32 20.0, %v981_v49  ;;  %v897_v35 = vmul.f32 20.0, %v876_v13  ;;  %v1017_v11 = vperm.slane %v1001_v16, %v2908_v26 }
 0x18d   :  { %1421 = vadd.xlane.f32.xlu2 %v2876_v40  ;;  %1424 = vadd.xlane.f32.xlu0 %v2880_v22  ;;  %v2966_v40 = vsel %vm58_vm0, %v2718_v57, 0.0  ;;  %v743_v0 = vmul.f32 %v742_v24, %v2893_v53  ;;  %v747_v22 = vand.u32 2147483648, %v2893_v53  ;;  %v841_v19 = vsel %vm825_vm5, %v817_v29, %v1593_v8  ;;  %v984_v29 = vpop.xlane.xlu2 %983 }
 0x18e   :  { %v765_v9 = vsub.f32 1.5, %v764_v39  ;;  %v1682_v48 = vpop.eup %1681  ;;  %v849_v12 = vmul.f32 20.0, %v841_v19  ;;  %v1018_v7 = vperm.slane %v1002_v37, %v2908_v26  ;;  %v1594_v24 = vadd.f32 -0.23971277, %v2895_v52 }
 0x18f   :  { %1353 = vadd.xlane.f32.xlu1 %v2872_v50  ;;  %v745_v57 = vsel %vm744_vm6, %v2893_v53, %v743_v0  ;;  %v691_v50 = vmax.f32 %v683_v6, 0.0  ;;  %v786_v34 = vmul.f32 %v1682_v48, %v2948_v41  ;;  %v1429_v8 = vsel %vm58_vm0, %v2721_v60, 0.0 }
 0x190   :  { %v748_v36 = vsel %vm746_vm8, %v747_v22, %v745_v57  ;;  %v766_v38 = vmul.f32 %v1680_v30, %v765_v9  ;;  %v916_v32 = vperm.slane %v849_v12, %v2908_v26  ;;  %v1025_v22 = vsel %vm920_vm15, %v1018_v7, %v1017_v11 }
 0x191   :  { %v808_v28 = vmul.f32 0.47942555, %v748_v36  ;;  %v2980_v23 = vmin.f32 %v691_v50, 1.0  ;;  %v787_v17 = vmul.f32 %v1682_v48, %v786_v34  ;;  %v1003_v6 = vmul.f32 20.0, %v984_v29 }
 0x192   :  { %v767_v20 = vmul.f32 %v766_v38, %v2924_v54  ;;  %v879_v50 = vpop.xlane.xlu1 %878  ;;  %vm792_vm14 = vcmp.eq.f32.partialorder %v2948_v41, inf  ;;  %v795_v9 = vand.u32 2147483648, %v2948_v41  ;;  %vm928_vm1 = vcmask 1045509  }
 0x193   :  { %v816_v53 = vsub.f32 %v800_v25, %v808_v28  ;;  %1683 = vrsqrt.f32 %v2980_v23  ;;  %v788_v62 = vmul.f32 0.5, %v787_v17  ;;  %v882_v25 = vpop.xlane.xlu0 %881  ;;  %v1019_v60 = vperm.slane %v1003_v6, %v2908_v26 }
 0x194   :  { %v769_v30 = vsel %vm768_vm11, %v2924_v54, %v767_v20  ;;  %v898_v28 = vmul.f32 20.0, %v879_v50  ;;  %vm794_vm3 = vcmp.eq.f32.partialorder %v2948_v41, 0.0  ;;  %vm780_vm4 = vcmp.eq.f32.partialorder %v2980_v23, inf }
 0x195   :  { %1359 = vadd.xlane.f32.xlu2 %v2890_v31  ;;  %1427 = vadd.xlane.f32.xlu0 %v2903_v2  ;;  %v840_v31 = vsel %vm824_vm9, %v816_v53, %v1592_v56  ;;  %v943_v2 = vperm.slane %v896_v45, %v2908_v26  ;;  %v772_v55 = vsel %vm770_vm12, %v771_v14, %v769_v30  ;;  %v789_v5 = vsub.f32 1.5, %v788_v62 }
 0x196   :  { %v848_v21 = vmul.f32 20.0, %v840_v31  ;;  %v810_v4 = vmul.f32 0.47942555, %v772_v55  ;;  %v1026_v12 = vsel %vm922_vm2, %v1019_v60, %v1025_v22  ;;  %v945_v45 = vperm.slane %v898_v28, %v2908_v26 }
 0x197   :  { %1356 = vadd.xlane.f32.xlu1 %v2884_v15  ;;  %v944_v15 = vperm.slane %v897_v35, %v2908_v26  ;;  %v790_v39 = vmul.f32 %v1682_v48, %v789_v5  ;;  %v1432_v31 = vsel %vm58_vm0, %v2729_v33, 0.0  ;;  %v804_v35 = vmul.f32 0.87758255, %v2926_v43 }
 0x198   :  { %v915_v10 = vperm.slane %v848_v21, %v2908_v26  ;;  %v818_v19 = vsub.f32 %v802_v63, %v810_v4  ;;  %v1293_v62 = vsel %vm58_vm0, %v2724_v42, 0.0  ;;  %v783_v11 = vand.u32 2147483648, %v2980_v23 }
 0x199   :  { %v1684_v0 = vpop.eup %1683  ;;  %v951_v54 = vsel %vm920_vm15, %v944_v15, %v943_v2  ;;  %vm782_vm5 = vcmp.eq.f32.partialorder %v2980_v23, 0.0  ;;  %v1438_v42 = vsel %vm58_vm0, %v2739_v61, 0.0  ;;  %v1596_v4 = vadd.f32 -0.23971277, %v2926_v43 }
 0x19a   :  { %v925_v44 = vsel %vm924_vm7, %v915_v10, %v2957_v1  ;;  %v774_v36 = vmul.f32 %v1684_v0, %v2980_v23  ;;  %v899_v1 = vmul.f32 20.0, %v882_v25  ;;  %v842_v56 = vsel %vm826_vm13, %v818_v19, %v1594_v24  ;;  %v987_v37 = vpop.xlane.xlu1 %986 }
 0x19b   :  { %v927_v57 = vsel %vm926_vm10, %v916_v32, %v925_v44  ;;  %v850_v48 = vmul.f32 20.0, %v842_v56  ;;  %v952_v16 = vsel %vm922_vm2, %v945_v45, %v951_v54  ;;  %v1055_v2 = vpop.xlane.xlu0 %1054  ;;  %v1004_v30 = vmul.f32 20.0, %v987_v37 }
 0x19c   :  { %v775_v51 = vmul.f32 %v1684_v0, %v774_v36  ;;  %v946_v63 = vperm.slane %v899_v1, %v2908_v26  ;;  %v1076_v32 = vmul.f32 20.0, %v1055_v2  ;;  %vm828_vm6 = vcmp.gt.f32.partialorder %v2926_v43, -0.87758255 }
 0x19d   :  { %1362 = vadd.xlane.f32.xlu2 %v2966_v40  ;;  %1430 = vadd.xlane.f32.xlu0 %v1429_v8  ;;  %v791_v40 = vmul.f32 %v790_v39, %v2948_v41  ;;  %v917_v38 = vperm.slane %v850_v48, %v2908_v26  ;;  %v1020_v7 = vperm.slane %v1004_v30, %v2908_v26  ;;  %v803_v8 = vmul.f32 0.87758255, %v2942_v3 }
 0x19e   :  { %v776_v52 = vmul.f32 0.5, %v775_v51  ;;  %v953_v13 = vsel %vm924_vm7, %v946_v63, %v952_v16  ;;  %v1092_v55 = vperm.slane %v1076_v32, %v2908_v26  ;;  %v1595_v6 = vadd.f32 -0.23971277, %v2942_v3 }
 0x19f   :  { %1291 = vadd.xlane.f32.xlu1 %v2962_v58  ;;  %v793_v53 = vsel %vm792_vm14, %v2948_v41, %v791_v40  ;;  %v1052_v58 = vpop.xlane.xlu2 %1051  ;;  %v929_v20 = vsel %vm928_vm1, %v917_v38, %v927_v57  ;;  %v1367_v41 = vsel %vm58_vm0, %v2732_v27, 0.0  ;;  %v1027_v29 = vsel %vm924_vm7, %v1020_v7, %v1026_v12 }
 0x1a0   :  { %v796_v34 = vsel %vm794_vm3, %v795_v9, %v793_v53  ;;  %v777_v49 = vsub.f32 1.5, %v776_v52  ;;  %v1075_v17 = vmul.f32 20.0, %v1052_v58  ;;  %v1364_v39 = vsel %vm58_vm0, %v2735_v46, 0.0 }
 0x1a1   :  { %v812_v14 = vmul.f32 0.47942555, %v796_v34  ;;  %vm827_vm8 = vcmp.gt.f32.partialorder %v2942_v3, -0.87758255  ;;  %vm930_vm9 = vcmask 1046534   ;;  %vm932_vm11 = vcmask 1047559  }
 0x1a2   :  { %v778_v21 = vmul.f32 %v1684_v0, %v777_v49  ;;  %v1091_v27 = vperm.slane %v1075_v17, %v2908_v26  ;;  %v885_v57 = vpop.xlane.xlu1 %884  ;;  %v1435_v16 = vsel %vm58_vm0, %v2750_v59, 0.0  ;;  %vm895_vm12 = vcmp.eq.s32.totalorder %v2908_v26, 0 }
 0x1a3   :  { %v820_v10 = vsub.f32 %v804_v35, %v812_v14  ;;  %v1058_v19 = vpop.xlane.xlu0 %1057  ;;  %v900_v25 = vmul.f32 20.0, %v885_v57  ;;  %vm1074_vm13 = vcmp.eq.s32.totalorder %v2908_v26, 2  ;;  %vm1148_vm14 = vcmp.eq.s32.totalorder %v2908_v26, 3 }
 0x1a4   :  { %v779_v33 = vmul.f32 %v778_v21, %v2980_v23  ;;  %v1099_v5 = vsel %vm920_vm15, %v1092_v55, %v1091_v27  ;;  %v1077_v36 = vmul.f32 20.0, %v1058_v19  ;;  %vm1222_vm3 = vcmp.eq.s32.totalorder %v2908_v26, 4 }
 0x1a5   :  { %1433 = vadd.xlane.f32.xlu2 %v1432_v31  ;;  %1368 = vadd.xlane.f32.xlu0 %v1367_v41  ;;  %v844_v22 = vsel %vm828_vm6, %v820_v10, %v1596_v4  ;;  %v947_v56 = vperm.slane %v900_v25, %v2908_v26  ;;  %vm1444_vm6 = vcmp.eq.s32.totalorder %v2908_v26, 7 }
 0x1a6   :  { %v781_v15 = vsel %vm780_vm4, %v2980_v23, %v779_v33  ;;  %v1441_v23 = vsel %vm58_vm0, %v2746_v47, 0.0  ;;  %v852_v50 = vmul.f32 20.0, %v844_v22  ;;  %v1093_v28 = vperm.slane %v1077_v36, %v2908_v26 }
 0x1a7   :  { %1294 = vadd.xlane.f32.xlu1 %v1293_v62  ;;  %v784_v24 = vsel %vm782_vm5, %v783_v11, %v781_v15  ;;  %v990_v44 = vpop.xlane.xlu2 %989  ;;  %v954_v40 = vsel %vm926_vm10, %v947_v56, %v953_v13  ;;  %vm1000_vm0 = vcmp.eq.s32.totalorder %v2908_v26, 1  ;;  %vm1296_vm4 = vcmp.eq.s32.totalorder %v2908_v26, 5 }
 0x1a8   :  { %v811_v0 = vmul.f32 0.47942555, %v784_v24  ;;  %v1005_v54 = vmul.f32 20.0, %v990_v44  ;;  %v1100_v3 = vsel %vm922_vm2, %v1093_v28, %v1099_v5  ;;  %v919_v9 = vperm.slane %v852_v50, %v2908_v26 }
 0x1a9   :  { %vm1370_vm5 = vcmp.eq.s32.totalorder %v2908_v26, 6 }
 0x1aa   :  { %v819_v61 = vsub.f32 %v803_v8, %v811_v0  ;;  %v1021_v43 = vperm.slane %v1005_v54, %v2908_v26  ;;  %v888_v53 = vpop.xlane.xlu1 %887 }
 0x1ab   :  { %v1061_v45 = vpop.xlane.xlu0 %1060  ;;  %v901_v34 = vmul.f32 20.0, %v888_v53 }
 0x1ac   :  { %v843_v60 = vsel %vm827_vm8, %v819_v61, %v1595_v6  ;;  %v1028_v47 = vsel %vm926_vm10, %v1021_v43, %v1027_v29  ;;  %v1078_v38 = vmul.f32 20.0, %v1061_v45 }
 0x1ad   :  { %1439 = vadd.xlane.f32.xlu2 %v1438_v42  ;;  %1442 = vadd.xlane.f32.xlu0 %v1441_v23  ;;  %v851_v1 = vmul.f32 20.0, %v843_v60  ;;  %v948_v13 = vperm.slane %v901_v34, %v2908_v26 }
 0x1ae   :  { %v1094_v58 = vperm.slane %v1078_v38, %v2908_v26 }
 0x1af   :  { %1365 = vadd.xlane.f32.xlu1 %v1364_v39  ;;  %v918_v46 = vperm.slane %v851_v1, %v2908_v26  ;;  %v993_v51 = vpop.xlane.xlu2 %992 }
 0x1b0   :  { %v1006_v12 = vmul.f32 20.0, %v993_v51  ;;  %v1101_v31 = vsel %vm924_vm7, %v1094_v58, %v1100_v3 }
 0x1b1   :  { %v931_v48 = vsel %vm930_vm9, %v918_v46, %v929_v20  ;;  %v955_v20 = vsel %vm928_vm1, %v948_v13, %v954_v40 }
 0x1b2   :  { %v3067_v63 = vsel %vm932_vm11, %v919_v9, %v931_v48  ;;  %v1022_v52 = vperm.slane %v1006_v12, %v2908_v26  ;;  %v1126_v21 = vpop.xlane.xlu1 %1125 }
 0x1b3   :  { %v891_v41 = vpop.xlane.xlu0 %890  ;;  %v1149_v37 = vmul.f32 20.0, %v1126_v21 }
 0x1b4   :  { %v1029_v49 = vsel %vm928_vm1, %v1022_v52, %v1028_v47  ;;  %v902_v2 = vmul.f32 20.0, %v891_v41 }
 0x1b5   :  { %v1165_v32 = vperm.slane %v1149_v37, %v2908_v26 }
 0x1b6   :  { %v949_v59 = vperm.slane %v902_v2, %v2908_v26 }
 0x1b7   :  { %1436 = vadd.xlane.f32.xlu1 %v1435_v16  ;;  %v1129_v14 = vpop.xlane.xlu2 %1128 }
 0x1b8   :  { %v1150_v17 = vmul.f32 20.0, %v1129_v14  ;;  %v956_v30 = vsel %vm930_vm9, %v949_v59, %v955_v20 }
 0x1ba   :  { %v1166_v35 = vperm.slane %v1150_v17, %v2908_v26  ;;  %v996_v27 = vpop.xlane.xlu1 %995 }
 0x1bb   :  { %v1132_v10 = vpop.xlane.xlu0 %1131  ;;  %v1007_v15 = vmul.f32 20.0, %v996_v27 }
 0x1bc   :  { %v1173_v62 = vsel %vm920_vm15, %v1166_v35, %v1165_v32  ;;  %v1151_v7 = vmul.f32 20.0, %v1132_v10 }
 0x1bd   :  { %v1023_v24 = vperm.slane %v1007_v15, %v2908_v26 }
 0x1be   :  { %v1167_v4 = vperm.slane %v1151_v7, %v2908_v26 }
 0x1bf   :  { %v1064_v33 = vpop.xlane.xlu2 %1063  ;;  %v1030_v29 = vsel %vm930_vm9, %v1023_v24, %v1029_v49 }
 0x1c0   :  { %v1079_v11 = vmul.f32 20.0, %v1064_v33  ;;  %v1174_v5 = vsel %vm922_vm2, %v1167_v4, %v1173_v62 }
 0x1c2   :  { %v1095_v55 = vperm.slane %v1079_v11, %v2908_v26  ;;  %v894_v22 = vpop.xlane.xlu1 %893 }
 0x1c3   :  { %v1067_v44 = vpop.xlane.xlu0 %1066  ;;  %v903_v61 = vmul.f32 20.0, %v894_v22 }
 0x1c4   :  { %v1102_v42 = vsel %vm926_vm10, %v1095_v55, %v1101_v31  ;;  %v1080_v23 = vmul.f32 20.0, %v1067_v44 }
 0x1c5   :  { %v950_v57 = vperm.slane %v903_v61, %v2908_v26 }
 0x1c6   :  { %v1096_v19 = vperm.slane %v1080_v23, %v2908_v26 }
 0x1c7   :  { %v999_v8 = vpop.xlane.xlu2 %998  ;;  %v957_v36 = vsel %vm932_vm11, %v950_v57, %v956_v30 }
 0x1c8   :  { %v1008_v0 = vmul.f32 20.0, %v999_v8  ;;  %v1103_v43 = vsel %vm928_vm1, %v1096_v19, %v1102_v42  ;;  %v3100_v25 = vsel %vm895_vm12, %v3067_v63, %v957_v36 }
 0x1ca   :  { %v1024_v54 = vperm.slane %v1008_v0, %v2908_v26  ;;  %v1135_v28 = vpop.xlane.xlu1 %1134 }
 0x1cb   :  { %v1203_v47 = vpop.xlane.xlu0 %1202  ;;  %v1152_v46 = vmul.f32 20.0, %v1135_v28 }
 0x1cc   :  { %v1031_v6 = vsel %vm932_vm11, %v1024_v54, %v1030_v29  ;;  %v1224_v56 = vmul.f32 20.0, %v1203_v47 }
 0x1cd   :  { %v3095_v39 = vsel %vm1000_vm0, %v3067_v63, %v1031_v6  ;;  %v1168_v9 = vperm.slane %v1152_v46, %v2908_v26 }
 0x1ce   :  { %v1478_v60 = vmax.f32 %v3100_v25, %v3095_v39  ;;  %v1240_v40 = vperm.slane %v1224_v56, %v2908_v26 }
 0x1cf   :  { %v1200_v50 = vpop.xlane.xlu2 %1199  ;;  %v1175_v48 = vsel %vm924_vm7, %v1168_v9, %v1174_v5 }
 0x1d0   :  { %v1223_v1 = vmul.f32 20.0, %v1200_v50 }
 0x1d2   :  { %v1239_v3 = vperm.slane %v1223_v1, %v2908_v26  ;;  %v1070_v52 = vpop.xlane.xlu1 %1069 }
 0x1d3   :  { %v1206_v53 = vpop.xlane.xlu0 %1205  ;;  %v1081_v16 = vmul.f32 20.0, %v1070_v52 }
 0x1d4   :  { %v1247_v51 = vsel %vm920_vm15, %v1240_v40, %v1239_v3  ;;  %v1225_v34 = vmul.f32 20.0, %v1206_v53 }
 0x1d5   :  { %v1097_v13 = vperm.slane %v1081_v16, %v2908_v26 }
 0x1d6   :  { %v1241_v58 = vperm.slane %v1225_v34, %v2908_v26 }
 0x1d7   :  { %v1138_v12 = vpop.xlane.xlu2 %1137  ;;  %v1104_v20 = vsel %vm930_vm9, %v1097_v13, %v1103_v43 }
 0x1d8   :  { %v1153_v45 = vmul.f32 20.0, %v1138_v12  ;;  %v1248_v31 = vsel %vm922_vm2, %v1241_v58, %v1247_v51 }
 0x1da   :  { %v1169_v38 = vperm.slane %v1153_v45, %v2908_v26  ;;  %v1073_v21 = vpop.xlane.xlu1 %1072 }
 0x1db   :  { %v1209_v41 = vpop.xlane.xlu0 %1208  ;;  %v1082_v35 = vmul.f32 20.0, %v1073_v21 }
 0x1dc   :  { %v1176_v49 = vsel %vm926_vm10, %v1169_v38, %v1175_v48  ;;  %v1226_v37 = vmul.f32 20.0, %v1209_v41 }
 0x1dd   :  { %v1098_v30 = vperm.slane %v1082_v35, %v2908_v26 }
 0x1de   :  { %v1242_v32 = vperm.slane %v1226_v37, %v2908_v26 }
 0x1df   :  { %v1141_v14 = vpop.xlane.xlu2 %1140  ;;  %v1105_v33 = vsel %vm932_vm11, %v1098_v30, %v1104_v20 }
 0x1e0   :  { %v1154_v17 = vmul.f32 20.0, %v1141_v14  ;;  %v1249_v62 = vsel %vm924_vm7, %v1242_v32, %v1248_v31  ;;  %v3123_v11 = vsel %vm1074_vm13, %v3067_v63, %v1105_v33 }
 0x1e1   :  { %v1479_v27 = vmax.f32 %v1478_v60, %v3123_v11 }
 0x1e2   :  { %v1170_v2 = vperm.slane %v1154_v17, %v2908_v26  ;;  %v1274_v7 = vpop.xlane.xlu1 %1273 }
 0x1e3   :  { %v1144_v55 = vpop.xlane.xlu0 %1143  ;;  %v1297_v58 = vmul.f32 20.0, %v1274_v7 }
 0x1e4   :  { %v1177_v59 = vsel %vm928_vm1, %v1170_v2, %v1176_v49  ;;  %v1155_v15 = vmul.f32 20.0, %v1144_v55 }
 0x1e5   :  { %v1313_v21 = vperm.slane %v1297_v58, %v2908_v26 }
 0x1e6   :  { %v1171_v4 = vperm.slane %v1155_v15, %v2908_v26 }
 0x1e7   :  { %v1277_v10 = vpop.xlane.xlu2 %1276 }
 0x1e8   :  { %v1178_v0 = vsel %vm930_vm9, %v1171_v4, %v1177_v59  ;;  %v1298_v14 = vmul.f32 20.0, %v1277_v10 }
 0x1ea   :  { %v1212_v5 = vpop.xlane.xlu1 %1211  ;;  %v1314_v59 = vperm.slane %v1298_v14, %v2908_v26 }
 0x1eb   :  { %v1147_v24 = vpop.xlane.xlu0 %1146  ;;  %v1227_v57 = vmul.f32 20.0, %v1212_v5 }
 0x1ec   :  { %v1156_v29 = vmul.f32 20.0, %v1147_v24  ;;  %v1321_v33 = vsel %vm920_vm15, %v1314_v59, %v1313_v21 }
 0x1ed   :  { %v1243_v1 = vperm.slane %v1227_v57, %v2908_v26 }
 0x1ee   :  { %v1172_v8 = vperm.slane %v1156_v29, %v2908_v26 }
 0x1ef   :  { %v1280_v42 = vpop.xlane.xlu2 %1279  ;;  %v1250_v3 = vsel %vm926_vm10, %v1243_v1, %v1249_v62 }
 0x1f0   :  { %v1179_v44 = vsel %vm932_vm11, %v1172_v8, %v1178_v0  ;;  %v1299_v13 = vmul.f32 20.0, %v1280_v42 }
 0x1f1   :  { %v3132_v22 = vsel %vm1148_vm14, %v3067_v63, %v1179_v44 }
 0x1f2   :  { %v1480_v23 = vmax.f32 %v1479_v27, %v3132_v22  ;;  %v1215_v6 = vpop.xlane.xlu1 %1214  ;;  %v1315_v37 = vperm.slane %v1299_v13, %v2908_v26 }
 0x1f3   :  { %v1348_v61 = vpop.xlane.xlu0 %1347  ;;  %v1228_v50 = vmul.f32 20.0, %v1215_v6 }
 0x1f4   :  { %v1322_v10 = vsel %vm922_vm2, %v1315_v37, %v1321_v33  ;;  %v1371_v29 = vmul.f32 20.0, %v1348_v61 }
 0x1f5   :  { %v1244_v47 = vperm.slane %v1228_v50, %v2908_v26 }
 0x1f6   :  { %v1387_v61 = vperm.slane %v1371_v29, %v2908_v26 }
 0x1f7   :  { %v1283_v54 = vpop.xlane.xlu2 %1282  ;;  %v1251_v51 = vsel %vm928_vm1, %v1244_v47, %v1250_v3 }
 0x1f8   :  { %v1300_v17 = vmul.f32 20.0, %v1283_v54 }
 0x1fa   :  { %v1351_v36 = vpop.xlane.xlu1 %1350  ;;  %v1316_v32 = vperm.slane %v1300_v17, %v2908_v26 }
 0x1fb   :  { %v1286_v43 = vpop.xlane.xlu0 %1285  ;;  %v1372_v55 = vmul.f32 20.0, %v1351_v36 }
 0x1fc   :  { %v1301_v41 = vmul.f32 20.0, %v1286_v43  ;;  %v1323_v4 = vsel %vm924_vm7, %v1316_v32, %v1322_v10 }
 0x1fd   :  { %v1388_v6 = vperm.slane %v1372_v55, %v2908_v26 }
 0x1fe   :  { %v1317_v30 = vperm.slane %v1301_v41, %v2908_v26 }
 0x1ff   :  { %v1218_v19 = vpop.xlane.xlu2 %1217 }
 0x200   :  { %v1229_v60 = vmul.f32 20.0, %v1218_v19  ;;  %v1324_v8 = vsel %vm926_vm10, %v1317_v30, %v1323_v4 }
 0x202   :  { %v1245_v28 = vperm.slane %v1229_v60, %v2908_v26  ;;  %v1354_v9 = vpop.xlane.xlu1 %1353 }
 0x203   :  { %v1289_v40 = vpop.xlane.xlu0 %1288  ;;  %v1373_v24 = vmul.f32 20.0, %v1354_v9 }
 0x204   :  { %v1252_v12 = vsel %vm930_vm9, %v1245_v28, %v1251_v51  ;;  %v1302_v2 = vmul.f32 20.0, %v1289_v40 }
 0x205   :  { %v1389_v43 = vperm.slane %v1373_v24, %v2908_v26 }
 0x206   :  { %v1318_v27 = vperm.slane %v1302_v2, %v2908_v26 }
 0x207   :  { %v1221_v56 = vpop.xlane.xlu2 %1220 }
 0x208   :  { %v1230_v46 = vmul.f32 20.0, %v1221_v56  ;;  %v1325_v44 = vsel %vm928_vm1, %v1318_v27, %v1324_v8  ;;  %v1395_v56 = vsel %vm920_vm15, %v1388_v6, %v1387_v61 }
 0x209   :  { %v1396_v9 = vsel %vm922_vm2, %v1389_v43, %v1395_v56 }
 0x20a   :  { %v1246_v48 = vperm.slane %v1230_v46, %v2908_v26  ;;  %v1357_v16 = vpop.xlane.xlu1 %1356 }
 0x20b   :  { %v1425_v34 = vpop.xlane.xlu0 %1424  ;;  %v1374_v0 = vmul.f32 20.0, %v1357_v16 }
 0x20c   :  { %v1253_v45 = vsel %vm932_vm11, %v1246_v48, %v1252_v12  ;;  %v1446_v51 = vmul.f32 20.0, %v1425_v34 }
 0x20d   :  { %v3145_v53 = vsel %vm1222_vm3, %v3067_v63, %v1253_v45  ;;  %v1390_v50 = vperm.slane %v1374_v0, %v2908_v26 }
 0x20e   :  { %v3148_v52 = vmax.f32 %v1480_v23, %v3145_v53  ;;  %v1462_v34 = vperm.slane %v1446_v51, %v2908_v26 }
 0x20f   :  { %v1422_v38 = vpop.xlane.xlu2 %1421  ;;  %v1397_v16 = vsel %vm924_vm7, %v1390_v50, %v1396_v9 }
 0x210   :  { %v1445_v45 = vmul.f32 20.0, %v1422_v38 }
 0x212   :  { %v1292_v20 = vpop.xlane.xlu1 %1291  ;;  %v1461_v2 = vperm.slane %v1445_v45, %v2908_v26 }
 0x213   :  { %v1428_v31 = vpop.xlane.xlu0 %1427  ;;  %v1303_v35 = vmul.f32 20.0, %v1292_v20 }
 0x214   :  { %v1469_v27 = vsel %vm920_vm15, %v1462_v34, %v1461_v2 }
 0x215   :  { %v1319_v7 = vperm.slane %v1303_v35, %v2908_v26 }
 0x217   :  { %v1360_v49 = vpop.xlane.xlu2 %1359  ;;  %v1326_v19 = vsel %vm930_vm9, %v1319_v7, %v1325_v44 }
 0x218   :  { %v1375_v54 = vmul.f32 20.0, %v1360_v49  ;;  %v1447_v49 = vmul.f32 20.0, %v1428_v31 }
 0x21a   :  { %v1295_v42 = vpop.xlane.xlu1 %1294  ;;  %v1391_v47 = vperm.slane %v1375_v54, %v2908_v26  ;;  %v1463_v38 = vperm.slane %v1447_v49, %v2908_v26 }
 0x21b   :  { %v1431_v15 = vpop.xlane.xlu0 %1430  ;;  %v1304_v5 = vmul.f32 20.0, %v1295_v42 }
 0x21c   :  { %v1398_v58 = vsel %vm926_vm10, %v1391_v47, %v1397_v16  ;;  %v1448_v13 = vmul.f32 20.0, %v1431_v15  ;;  %v1470_v7 = vsel %vm922_vm2, %v1463_v38, %v1469_v27  ;;  %vm1527_vm2 = vcmask 64512  }
 0x21d   :  { %v1320_v23 = vperm.slane %v1304_v5, %v2908_v26 }
 0x21e   :  { %v1464_v37 = vperm.slane %v1448_v13, %v2908_v26 }
 0x21f   :  { %v1363_v62 = vpop.xlane.xlu2 %1362  ;;  %v1327_v36 = vsel %vm932_vm11, %v1320_v23, %v1326_v19 }
 0x220   :  { %v1376_v57 = vmul.f32 20.0, %v1363_v62  ;;  %v3171_v60 = vsel %vm1296_vm4, %v3067_v63, %v1327_v36  ;;  %v1471_v15 = vsel %vm924_vm7, %v1464_v37, %v1470_v7 }
 0x221   :  { %v1482_v28 = vmax.f32 %v3148_v52, %v3171_v60 }
 0x222   :  { %v1392_v46 = vperm.slane %v1376_v57, %v2908_v26  ;;  %v1366_v40 = vpop.xlane.xlu1 %1365 }
 0x223   :  { %v1369_v3 = vpop.xlane.xlu0 %1368  ;;  %v1377_v12 = vmul.f32 20.0, %v1366_v40 }
 0x224   :  { %v1378_v48 = vmul.f32 20.0, %v1369_v3  ;;  %v1399_v14 = vsel %vm928_vm1, %v1392_v46, %v1398_v58 }
 0x225   :  { %v1393_v20 = vperm.slane %v1377_v12, %v2908_v26 }
 0x226   :  { %v1394_v52 = vperm.slane %v1378_v48, %v2908_v26 }
 0x227   :  { %v1434_v1 = vpop.xlane.xlu2 %1433  ;;  %v1400_v41 = vsel %vm930_vm9, %v1393_v20, %v1399_v14  ;;  %v1522_v20 = vshrl.u32 %v853_v18, 7 }
 0x228   :  { %v1449_v17 = vmul.f32 20.0, %v1434_v1  ;;  %v1401_v31 = vsel %vm932_vm11, %v1394_v52, %v1400_v41 }
 0x229   :  { %v1403_v35 = vsel %vm1370_vm5, %v3067_v63, %v1401_v31  ;;  %vm1525_vm15 = vcmp.lt.s32.totalorder %v1522_v20, 2 }
 0x22a   :  { %v1465_v59 = vperm.slane %v1449_v17, %v2908_v26  ;;  %v1483_v32 = vmax.f32 %v1482_v28, %v1403_v35  ;;  %v1437_v33 = vpop.xlane.xlu1 %1436 }
 0x22b   :  { %v1443_v62 = vpop.xlane.xlu0 %1442  ;;  %v1450_v55 = vmul.f32 20.0, %v1437_v33 }
 0x22c   :  { %v1452_v10 = vmul.f32 20.0, %v1443_v62  ;;  %v1472_v4 = vsel %vm926_vm10, %v1465_v59, %v1471_v15 }
 0x22d   :  { %v1466_v42 = vperm.slane %v1450_v55, %v2908_v26 }
 0x22e   :  { %v1468_v5 = vperm.slane %v1452_v10, %v2908_v26 }
 0x22f   :  { %v1440_v21 = vpop.xlane.xlu2 %1439  ;;  %v1473_v29 = vsel %vm928_vm1, %v1466_v42, %v1472_v4 }
 0x230   :  { %v1451_v30 = vmul.f32 20.0, %v1440_v21 }
 0x232   :  { %v1467_v24 = vperm.slane %v1451_v30, %v2908_v26 }
 0x234   :  { %v1474_v8 = vsel %vm930_vm9, %v1467_v24, %v1473_v29 }
 0x235   :  { %v1475_v0 = vsel %vm932_vm11, %v1468_v5, %v1474_v8 }
 0x236   :  { %v1477_v44 = vsel %vm1444_vm6, %v3067_v63, %v1475_v0 }
 0x237   :  { %v1484_v54 = vmax.f32 %v1483_v32, %v1477_v44 }
 0x239   :  { %v1513_v23 = vsub.f32 %v1477_v44, %v1484_v54  ;;  %v1485_v6 = vsub.f32 %v3100_v25, %v1484_v54  ;;  %v1489_v19 = vsub.f32 %v3095_v39, %v1484_v54  ;;  %v1493_v57 = vsub.f32 %v3123_v11, %v1484_v54 }
 0x23a   :  { %v1497_v43 = vsub.f32 %v3132_v22, %v1484_v54  ;;  %v1501_v26 = vsub.f32 %v3145_v53, %v1484_v54  ;;  %v1505_v36 = vsub.f32 %v3171_v60, %v1484_v54  ;;  %v1509_v61 = vsub.f32 %v1403_v35, %v1484_v54 }
 0x23b   :  { %v1486_v50 = vmul.f32 1.442695, %v1485_v6  ;;  %v1490_v1 = vmul.f32 1.442695, %v1489_v19  ;;  %v1494_v47 = vmul.f32 1.442695, %v1493_v57 }
 0x23c   :  { %v1498_v28 = vmul.f32 1.442695, %v1497_v43  ;;  %v1502_v56 = vmul.f32 1.442695, %v1501_v26  ;;  %v1506_v25 = vmul.f32 1.442695, %v1505_v36 }
 0x23d   :  { %1685 = vpow2.f32 %v1486_v50  ;;  %v1510_v11 = vmul.f32 1.442695, %v1509_v61  ;;  %v1514_v53 = vmul.f32 1.442695, %v1513_v23 }
 0x23e   :  { %1687 = vpow2.f32 %v1490_v1 }
 0x23f   :  { %1689 = vpow2.f32 %v1494_v47 }
 0x240   :  { %1691 = vpow2.f32 %v1498_v28 }
 0x241   :  { %1693 = vpow2.f32 %v1502_v56 }
 0x242   :  { %1695 = vpow2.f32 %v1506_v25 }
 0x243   :  { %v1686_v39 = vpop.eup %1685  ;;  %1697 = vpow2.f32 %v1510_v11 }
 0x244   :  { %v1688_v46 = vpop.eup %1687  ;;  %1699 = vpow2.f32 %v1514_v53 }
 0x245   :  { %v1492_v22 = vadd.f32 %v1688_v46, %v1686_v39  ;;  %v1690_v3 = vpop.eup %1689 }
 0x246   :  { %v1692_v40 = vpop.eup %1691 }
 0x247   :  { %v1496_v60 = vadd.f32 %v1690_v3, %v1492_v22  ;;  %v1694_v51 = vpop.eup %1693 }
 0x248   :  { %v1696_v12 = vpop.eup %1695 }
 0x249   :  { %v1500_v9 = vadd.f32 %v1692_v40, %v1496_v60  ;;  %v1698_v16 = vpop.eup %1697 }
 0x24a   :  { %v1700_v58 = vpop.eup %1699 }
 0x24b   :  { %v1504_v48 = vadd.f32 %v1694_v51, %v1500_v9 }
 0x24d   :  { %v1508_v45 = vadd.f32 %v1696_v12, %v1504_v48 }
 0x24f   :  { %v1512_v49 = vadd.f32 %v1698_v16, %v1508_v45 }
 0x251   :  { %v1516_v13 = vadd.f32 %v1700_v58, %v1512_v49 }
 0x253   :  { %1701 = vlog2.f32 %v1516_v13 }
 0x259   :  { %v1702_v52 = vpop.eup %1701 }
 0x25a   :  { %v1518_v14 = vmul.f32 0.6931472, %v1702_v52 }
 0x25c   :  { %v1519_v17 = vadd.f32 %v1518_v14, %v1484_v54 }
 0x25e   :  { %v1520_v34 = vsub.f32 %v1519_v17, %v3067_v63 }
 0x260   :  { %v1526_v41 = vsel %vm1525_vm15, %v1520_v34, 0.0 }
 0x261   :  { %v1528_v38 = vsel %vm1527_vm2, %v1526_v41, 0.0 }
 0x262   :  { %1529 = vadd.xlane.f32.xlu1 %v1528_v38 }
 0x2d5   :  { %v1530_v31 = vpop.xlane.xlu1 %1529 }
 0x2d6   :  { %v1531_v21 = vrot.slane %v1530_v31, 4 }
 0x2d8   :  { %v1532_v2 = vadd.f32 %v1531_v21, %v1530_v31 }
 0x2da   :  { %v1533_v37 = vrot.slane %v1532_v2, 2 }
 0x2dc   :  { %v1534_v35 = vadd.f32 %v1533_v37, %v1532_v2 }
 0x2de   :  { %v1535_v59 = vrot.slane %v1534_v35, 1 }
 0x2e0   :  { %v1536_v32 = vadd.f32 %v1535_v59, %v1534_v35 }
 0x2e2   :  { %1597 = vpush %v1536_v32 }
 0x313   :  { %s1598_s26 = spop %1597 }
 0x314   :  { %v1538_v18 = vstv %s1598_s26 }
 0x315   :  { %1539 = vst [vmem:[#allocation10] sm:$0xff] %v1538_v18 }
 0x316   :  { %1550 = dma.vmem_to_hbm [thread:$0]  %s1546_s25, 128, %s1548_s23, [#allocation7]  }
 0x317   :  { %1796 = dma.done.wait [#allocation7], 128  }
 0x318   :  { %1797 = vsyncadd [#allocation7], 4294967168 }
 0x319   :  { %1555 = vsyncpa [#allocation6], 1 }
 0x31a   :  { %1556 = vsyncpa [#allocation9], 1 }
 0x31b   :  { %1557 = vsyncpa [#allocation7], 1 }

</bundles_post_ra>
